<compile_context>
chip_gen: v5e
topology: v5e:2x2
jax: 0.10.0
libtpu: 0.0.40
codegen_flags: <defaults>
</compile_context>

<pallas_src>
import functools
import math

import jax
import jax.numpy as jnp
from jax.experimental import pallas as pl
from jax.experimental.pallas import tpu as pltpu


def _encoder_layer_kernel(*refs, d_k: int, eps: float, has_mask: bool):
    if has_mask:
        (x_ref, mask_ref,
         wq_ref, bq_ref, wk_ref, bk_ref, wv_ref, bv_ref,
         g1_ref, be1_ref, w1_ref, b1_ref, w2_ref, b2_ref, g2_ref, be2_ref,
         out_ref) = refs
    else:
        (x_ref,
         wq_ref, bq_ref, wk_ref, bk_ref, wv_ref, bv_ref,
         g1_ref, be1_ref, w1_ref, b1_ref, w2_ref, b2_ref, g2_ref, be2_ref,
         out_ref) = refs
        mask_ref = None

    tb, s, d = x_ref.shape                              # batch-tile, seq, d_model
    x = x_ref[...].astype(jnp.float32)                  # (TB, S, D)
    x2 = x.reshape(tb * s, d)
    xb = x2.astype(jnp.bfloat16)

    # Hoist bias / LayerNorm affine loads (each used once; keep f32 precision).
    bq = bq_ref[...]; bk = bk_ref[...]; bv = bv_ref[...]
    g1 = g1_ref[...]; be1 = be1_ref[...]
    b1 = b1_ref[...]; b2 = b2_ref[...]
    g2 = g2_ref[...]; be2 = be2_ref[...]

    # ---- Single-headed self-attention: Q/K/V projections (bf16 in, f32 acc) ----
    q = jnp.dot(xb, wq_ref[...], preferred_element_type=jnp.float32) + bq
    k = jnp.dot(xb, wk_ref[...], preferred_element_type=jnp.float32) + bk
    v = jnp.dot(xb, wv_ref[...], preferred_element_type=jnp.float32) + bv

    qb = q.reshape(tb, s, d).astype(jnp.bfloat16)
    kb = k.reshape(tb, s, d).astype(jnp.bfloat16)
    vb = v.reshape(tb, s, d).astype(jnp.bfloat16)

    scale = 1.0 / math.sqrt(d_k)
    scores = jnp.einsum("bqd,bkd->bqk", qb, kb,
                        preferred_element_type=jnp.float32) * scale    # (TB, S, S)
    if has_mask:
        scores = jnp.where(mask_ref[...] > 0, scores, -1e9)

    scores = scores - jnp.max(scores, axis=-1, keepdims=True)
    p = jnp.exp(scores)
    p = p * pl.reciprocal(jnp.sum(p, axis=-1, keepdims=True), approx=True)
    att = jnp.einsum("bqk,bkd->bqd", p.astype(jnp.bfloat16), vb,
                     preferred_element_type=jnp.float32)                # (TB, S, D)

    # ---- Residual + LayerNorm 1 (f32) ----
    y = x + att
    mu = jnp.mean(y, axis=-1, keepdims=True)
    var = jnp.mean((y - mu) * (y - mu), axis=-1, keepdims=True)
    y1 = (y - mu) * jax.lax.rsqrt(var + eps) * g1 + be1                 # (TB, S, D)

    # ---- FeedForward: Linear -> ReLU -> Linear (bf16 matmuls, f32 acc) ----
    y1_2 = y1.reshape(tb * s, d)
    h = jnp.dot(y1_2.astype(jnp.bfloat16), w1_ref[...],
                preferred_element_type=jnp.float32) + b1
    h = jnp.maximum(h, 0.0)
    ff = jnp.dot(h.astype(jnp.bfloat16), w2_ref[...],
                 preferred_element_type=jnp.float32) + b2

    # ---- Residual + LayerNorm 2 ----
    z = y1_2 + ff
    mu2 = jnp.mean(z, axis=-1, keepdims=True)
    var2 = jnp.mean((z - mu2) * (z - mu2), axis=-1, keepdims=True)
    out = (z - mu2) * jax.lax.rsqrt(var2 + eps) * g2 + be2

    out_ref[...] = out.reshape(tb, s, d).astype(out_ref.dtype)


def encoder_layer(x, params, mask=None, *, batch_tile: int = 2, eps: float = 1e-5):
    B, S, D = x.shape
    tb = math.gcd(B, max(1, batch_tile))        # batch elements per grid step
    has_mask = mask is not None

    # Matmul weights in bf16 (native MXU path, half the DMA); bias/LN params f32.
    param_list = [
        params["wq"].astype(jnp.bfloat16), params["bq"].astype(jnp.float32),
        params["wk"].astype(jnp.bfloat16), params["bk"].astype(jnp.float32),
        params["wv"].astype(jnp.bfloat16), params["bv"].astype(jnp.float32),
        params["g1"].astype(jnp.float32), params["be1"].astype(jnp.float32),
        params["w1"].astype(jnp.bfloat16), params["b1"].astype(jnp.float32),
        params["w2"].astype(jnp.bfloat16), params["b2"].astype(jnp.float32),
        params["g2"].astype(jnp.float32), params["be2"].astype(jnp.float32),
    ]

    in_specs = [pl.BlockSpec((tb, S, D), lambda b: (b, 0, 0))]
    operands = [x]
    if has_mask:
        m = jnp.broadcast_to(mask.astype(jnp.float32), (B, S, S))
        in_specs.append(pl.BlockSpec((tb, S, S), lambda b: (b, 0, 0)))
        operands.append(m)
    in_specs += [pl.BlockSpec(p.shape, lambda b: (0, 0)) for p in param_list]
    operands += param_list
    out_spec = pl.BlockSpec((tb, S, D), lambda b: (b, 0, 0))

    # Explicit VMEM budget: weights + tiles (double-buffered by Pallas) + slack.
    param_bytes = sum(p.size * p.dtype.itemsize for p in param_list)
    tile_bytes = tb * S * (D * x.dtype.itemsize * 2 + (S * 4 if has_mask else 0))
    vmem_limit = int(min(2 * (param_bytes + tile_bytes) + (16 << 20), 64 << 20))

    kernel = functools.partial(_encoder_layer_kernel, d_k=D, eps=eps,
                               has_mask=has_mask)

    return pl.pallas_call(
        kernel,
        out_shape=jax.ShapeDtypeStruct((B, S, D), x.dtype),
        grid=(B // tb,),
        in_specs=in_specs,
        out_specs=out_spec,
        compiler_params=pltpu.CompilerParams(
            dimension_semantics=("parallel",),
            vmem_limit_bytes=vmem_limit),
    )(*operands)


def encoder_layer_ref(x, params, mask=None, eps: float = 1e-5):
    """Pure-JAX f32 reference of the same forward pass."""
    D = x.shape[-1]
    q = x @ params["wq"] + params["bq"]
    k = x @ params["wk"] + params["bk"]
    v = x @ params["wv"] + params["bv"]
    s = jnp.einsum("bqd,bkd->bqk", q, k) / math.sqrt(D)
    if mask is not None:
        s = jnp.where(mask.astype(jnp.float32) > 0, s, -1e9)
    p = jax.nn.softmax(s, axis=-1)
    att = jnp.einsum("bqk,bkd->bqd", p, v)

    def ln(t, g, b):
        mu = jnp.mean(t, -1, keepdims=True)
        var = jnp.mean((t - mu) ** 2, -1, keepdims=True)
        return (t - mu) * jax.lax.rsqrt(var + eps) * g + b

    y1 = ln(x + att, params["g1"], params["be1"])
    ff = jnp.maximum(y1 @ params["w1"] + params["b1"], 0.0) @ params["w2"] + params["b2"]
    return ln(y1 + ff, params["g2"], params["be2"])


def make_params(key, d_model: int, d_ff: int):
    keys = jax.random.split(key, 10)
    scale = 0.02
    return {
        "wq": jax.random.normal(keys[0], (d_model, d_model), jnp.float32) * scale,
        "wk": jax.random.normal(keys[1], (d_model, d_model), jnp.float32) * scale,
        "wv": jax.random.normal(keys[2], (d_model, d_model), jnp.float32) * scale,
        "bq": jax.random.normal(keys[3], (1, d_model), jnp.float32) * scale,
        "bk": jax.random.normal(keys[4], (1, d_model), jnp.float32) * scale,
        "bv": jax.random.normal(keys[5], (1, d_model), jnp.float32) * scale,
        "g1": jnp.ones((1, d_model), jnp.float32),
        "be1": jnp.zeros((1, d_model), jnp.float32),
        "w1": jax.random.normal(keys[6], (d_model, d_ff), jnp.float32) * scale,
        "b1": jax.random.normal(keys[7], (1, d_ff), jnp.float32) * scale,
        "w2": jax.random.normal(keys[8], (d_ff, d_model), jnp.float32) * scale,
        "b2": jax.random.normal(keys[9], (1, d_model), jnp.float32) * scale,
        "g2": jnp.ones((1, d_model), jnp.float32),
        "be2": jnp.zeros((1, d_model), jnp.float32),
    }


if __name__ == "__main__":
    # Small but lane-dense shapes: d_model = 128 keeps stores unmasked.
    B, S, D, D_FF = 4, 16, 128, 256
    key = jax.random.PRNGKey(0)
    kx, kp = jax.random.split(key)
    x = jax.random.normal(kx, (B, S, D), jnp.float32)
    params = make_params(kp, D, D_FF)

    # Unmasked path (default forward: mask=None).
    out = jax.block_until_ready(encoder_layer(x, params, batch_tile=2))
    ref = encoder_layer_ref(x, params)
    assert out.shape == (B, S, D) and out.dtype == x.dtype
    err = float(jnp.max(jnp.abs(out - ref)))
    assert jnp.allclose(out, ref, atol=2e-2, rtol=2e-2), f"unmasked mismatch {err}"

    # Masked path (causal mask, PyTorch masked_fill(mask==0, -1e9) convention).
    causal = jnp.tril(jnp.ones((S, S), jnp.float32))
    out_m = jax.block_until_ready(encoder_layer(x, params, mask=causal, batch_tile=2))
    ref_m = encoder_layer_ref(x, params, mask=causal)
    err_m = float(jnp.max(jnp.abs(out_m - ref_m)))
    assert jnp.allclose(out_m, ref_m, atol=2e-2, rtol=2e-2), f"masked mismatch {err_m}"

    print("KERNEL_OK")
</pallas_src>

<mosaic_0001>
module attributes {stable_mosaic.version = 11 : i64} {
  func.func @_encoder_layer_kernel(%arg0: i32, %arg1: memref<2x16x128xf32, #tpu.memory_space<vmem>>, %arg2: memref<128x128xbf16, #tpu.memory_space<vmem>>, %arg3: memref<1x128xf32, #tpu.memory_space<vmem>>, %arg4: memref<128x128xbf16, #tpu.memory_space<vmem>>, %arg5: memref<1x128xf32, #tpu.memory_space<vmem>>, %arg6: memref<128x128xbf16, #tpu.memory_space<vmem>>, %arg7: memref<1x128xf32, #tpu.memory_space<vmem>>, %arg8: memref<1x128xf32, #tpu.memory_space<vmem>>, %arg9: memref<1x128xf32, #tpu.memory_space<vmem>>, %arg10: memref<128x256xbf16, #tpu.memory_space<vmem>>, %arg11: memref<1x256xf32, #tpu.memory_space<vmem>>, %arg12: memref<256x128xbf16, #tpu.memory_space<vmem>>, %arg13: memref<1x128xf32, #tpu.memory_space<vmem>>, %arg14: memref<1x128xf32, #tpu.memory_space<vmem>>, %arg15: memref<1x128xf32, #tpu.memory_space<vmem>>, %arg16: memref<2x16x128xf32, #tpu.memory_space<vmem>>) attributes {dimension_semantics = [#tpu.dimension_semantics<parallel>], iteration_bounds = array<i64: 2>, scalar_prefetch = 0 : i64, scratch_operands = 0 : i64, tpu.core_type = #tpu.core_type<tc>, window_params = [{transform_indices = @transform_0, window_bounds = array<i64: 2, 16, 128>}, {pipeline_mode = #tpu.pipeline_mode<synchronous>, transform_indices = @transform_1, window_bounds = array<i64: 128, 128>}, {pipeline_mode = #tpu.pipeline_mode<synchronous>, transform_indices = @transform_2, window_bounds = array<i64: 1, 128>}, {pipeline_mode = #tpu.pipeline_mode<synchronous>, transform_indices = @transform_3, window_bounds = array<i64: 128, 128>}, {pipeline_mode = #tpu.pipeline_mode<synchronous>, transform_indices = @transform_4, window_bounds = array<i64: 1, 128>}, {pipeline_mode = #tpu.pipeline_mode<synchronous>, transform_indices = @transform_5, window_bounds = array<i64: 128, 128>}, {pipeline_mode = #tpu.pipeline_mode<synchronous>, transform_indices = @transform_6, window_bounds = array<i64: 1, 128>}, {pipeline_mode = #tpu.pipeline_mode<synchronous>, transform_indices = @transform_7, window_bounds = array<i64: 1, 128>}, {pipeline_mode = #tpu.pipeline_mode<synchronous>, transform_indices = @transform_8, window_bounds = array<i64: 1, 128>}, {pipeline_mode = #tpu.pipeline_mode<synchronous>, transform_indices = @transform_9, window_bounds = array<i64: 128, 256>}, {pipeline_mode = #tpu.pipeline_mode<synchronous>, transform_indices = @transform_10, window_bounds = array<i64: 1, 256>}, {pipeline_mode = #tpu.pipeline_mode<synchronous>, transform_indices = @transform_11, window_bounds = array<i64: 256, 128>}, {pipeline_mode = #tpu.pipeline_mode<synchronous>, transform_indices = @transform_12, window_bounds = array<i64: 1, 128>}, {pipeline_mode = #tpu.pipeline_mode<synchronous>, transform_indices = @transform_13, window_bounds = array<i64: 1, 128>}, {pipeline_mode = #tpu.pipeline_mode<synchronous>, transform_indices = @transform_14, window_bounds = array<i64: 1, 128>}, {transform_indices = @transform_15, window_bounds = array<i64: 2, 16, 128>}]} {
    %c0 = arith.constant 0 : index
    %c0_0 = arith.constant 0 : index
    %c0_1 = arith.constant 0 : index
    %0 = vector.load %arg1[%c0, %c0_0, %c0_1] : memref<2x16x128xf32, #tpu.memory_space<vmem>>, vector<2x16x128xf32>
    %1 = vector.shape_cast %0 : vector<2x16x128xf32> to vector<32x128xf32>
    %2 = arith.truncf %1 : vector<32x128xf32> to vector<32x128xbf16>
    %c0_2 = arith.constant 0 : index
    %c0_3 = arith.constant 0 : index
    %3 = vector.load %arg3[%c0_2, %c0_3] : memref<1x128xf32, #tpu.memory_space<vmem>>, vector<1x128xf32>
    %c0_4 = arith.constant 0 : index
    %c0_5 = arith.constant 0 : index
    %4 = vector.load %arg5[%c0_4, %c0_5] : memref<1x128xf32, #tpu.memory_space<vmem>>, vector<1x128xf32>
    %c0_6 = arith.constant 0 : index
    %c0_7 = arith.constant 0 : index
    %5 = vector.load %arg7[%c0_6, %c0_7] : memref<1x128xf32, #tpu.memory_space<vmem>>, vector<1x128xf32>
    %c0_8 = arith.constant 0 : index
    %c0_9 = arith.constant 0 : index
    %6 = vector.load %arg8[%c0_8, %c0_9] : memref<1x128xf32, #tpu.memory_space<vmem>>, vector<1x128xf32>
    %c0_10 = arith.constant 0 : index
    %c0_11 = arith.constant 0 : index
    %7 = vector.load %arg9[%c0_10, %c0_11] : memref<1x128xf32, #tpu.memory_space<vmem>>, vector<1x128xf32>
    %c0_12 = arith.constant 0 : index
    %c0_13 = arith.constant 0 : index
    %8 = vector.load %arg11[%c0_12, %c0_13] : memref<1x256xf32, #tpu.memory_space<vmem>>, vector<1x256xf32>
    %c0_14 = arith.constant 0 : index
    %c0_15 = arith.constant 0 : index
    %9 = vector.load %arg13[%c0_14, %c0_15] : memref<1x128xf32, #tpu.memory_space<vmem>>, vector<1x128xf32>
    %c0_16 = arith.constant 0 : index
    %c0_17 = arith.constant 0 : index
    %10 = vector.load %arg14[%c0_16, %c0_17] : memref<1x128xf32, #tpu.memory_space<vmem>>, vector<1x128xf32>
    %c0_18 = arith.constant 0 : index
    %c0_19 = arith.constant 0 : index
    %11 = vector.load %arg15[%c0_18, %c0_19] : memref<1x128xf32, #tpu.memory_space<vmem>>, vector<1x128xf32>
    %c0_20 = arith.constant 0 : index
    %c0_21 = arith.constant 0 : index
    %12 = vector.load %arg2[%c0_20, %c0_21] : memref<128x128xbf16, #tpu.memory_space<vmem>>, vector<128x128xbf16>
    %cst = arith.constant dense<0.000000e+00> : vector<32x128xf32>
    %13 = tpu.matmul %2, %12, %cst {dimension_numbers = #tpu.dot_dimension_numbers<[1], [0], [0], [1], [0, 0, 1, 1], [], []>} : vector<32x128xbf16>, vector<128x128xbf16>, vector<32x128xf32> -> vector<32x128xf32>
    %14 = vector.broadcast %3 : vector<1x128xf32> to vector<32x128xf32>
    %15 = arith.addf %13, %14 : vector<32x128xf32>
    %c0_22 = arith.constant 0 : index
    %c0_23 = arith.constant 0 : index
    %16 = vector.load %arg4[%c0_22, %c0_23] : memref<128x128xbf16, #tpu.memory_space<vmem>>, vector<128x128xbf16>
    %cst_24 = arith.constant dense<0.000000e+00> : vector<32x128xf32>
    %17 = tpu.matmul %2, %16, %cst_24 {dimension_numbers = #tpu.dot_dimension_numbers<[1], [0], [0], [1], [0, 0, 1, 1], [], []>} : vector<32x128xbf16>, vector<128x128xbf16>, vector<32x128xf32> -> vector<32x128xf32>
    %18 = vector.broadcast %4 : vector<1x128xf32> to vector<32x128xf32>
    %19 = arith.addf %17, %18 : vector<32x128xf32>
    %c0_25 = arith.constant 0 : index
    %c0_26 = arith.constant 0 : index
    %20 = vector.load %arg6[%c0_25, %c0_26] : memref<128x128xbf16, #tpu.memory_space<vmem>>, vector<128x128xbf16>
    %cst_27 = arith.constant dense<0.000000e+00> : vector<32x128xf32>
    %21 = tpu.matmul %2, %20, %cst_27 {dimension_numbers = #tpu.dot_dimension_numbers<[1], [0], [0], [1], [0, 0, 1, 1], [], []>} : vector<32x128xbf16>, vector<128x128xbf16>, vector<32x128xf32> -> vector<32x128xf32>
    %22 = vector.broadcast %5 : vector<1x128xf32> to vector<32x128xf32>
    %23 = arith.addf %21, %22 : vector<32x128xf32>
    %24 = vector.shape_cast %15 : vector<32x128xf32> to vector<2x16x128xf32>
    %25 = arith.truncf %24 : vector<2x16x128xf32> to vector<2x16x128xbf16>
    %26 = vector.shape_cast %19 : vector<32x128xf32> to vector<2x16x128xf32>
    %27 = arith.truncf %26 : vector<2x16x128xf32> to vector<2x16x128xbf16>
    %28 = vector.shape_cast %23 : vector<32x128xf32> to vector<2x16x128xf32>
    %29 = arith.truncf %28 : vector<2x16x128xf32> to vector<2x16x128xbf16>
    "tpu.trace_start"() <{level = 10 : i32, message = "bqd,bkd->bqk"}> : () -> ()
    %cst_28 = arith.constant dense<0.000000e+00> : vector<2x16x16xf32>
    %30 = tpu.matmul %25, %27, %cst_28 {dimension_numbers = #tpu.dot_dimension_numbers<[2], [2], [1], [1], [0, 0, 0, 1, 1, 1], [0], [0]>} : vector<2x16x128xbf16>, vector<2x16x128xbf16>, vector<2x16x16xf32> -> vector<2x16x16xf32>
    "tpu.trace_stop"() : () -> ()
    %cst_29 = arith.constant 0.0883883461 : f32
    %31 = vector.broadcast %cst_29 : f32 to vector<2x16x16xf32>
    %32 = arith.mulf %30, %31 : vector<2x16x16xf32>
    %cst_30 = arith.constant dense<0xFF800000> : vector<2x16xf32>
    %33 = vector.multi_reduction <maximumf>, %32, %cst_30 [2] : vector<2x16x16xf32> to vector<2x16xf32>
    %34 = vector.shape_cast %33 : vector<2x16xf32> to vector<2x16x1xf32>
    %35 = vector.broadcast %34 : vector<2x16x1xf32> to vector<2x16x16xf32>
    %36 = arith.subf %32, %35 : vector<2x16x16xf32>
    %37 = math.exp %36 : vector<2x16x16xf32>
    %cst_31 = arith.constant dense<0.000000e+00> : vector<2x16xf32>
    %38 = vector.multi_reduction <add>, %37, %cst_31 [2] : vector<2x16x16xf32> to vector<2x16xf32>
    %39 = vector.shape_cast %38 : vector<2x16xf32> to vector<2x16x1xf32>
    %40 = tpu.reciprocal %39 {approx = true} : vector<2x16x1xf32> -> vector<2x16x1xf32>
    %41 = vector.broadcast %40 : vector<2x16x1xf32> to vector<2x16x16xf32>
    %42 = arith.mulf %37, %41 : vector<2x16x16xf32>
    %43 = arith.truncf %42 : vector<2x16x16xf32> to vector<2x16x16xbf16>
    "tpu.trace_start"() <{level = 10 : i32, message = "bqk,bkd->bqd"}> : () -> ()
    %cst_32 = arith.constant dense<0.000000e+00> : vector<2x16x128xf32>
    %44 = tpu.matmul %43, %29, %cst_32 {dimension_numbers = #tpu.dot_dimension_numbers<[2], [1], [1], [2], [0, 0, 0, 1, 1, 2], [0], [0]>} : vector<2x16x16xbf16>, vector<2x16x128xbf16>, vector<2x16x128xf32> -> vector<2x16x128xf32>
    "tpu.trace_stop"() : () -> ()
    %45 = arith.addf %0, %44 : vector<2x16x128xf32>
    %cst_33 = arith.constant dense<0.000000e+00> : vector<2x16xf32>
    %46 = vector.multi_reduction <add>, %45, %cst_33 [2] : vector<2x16x128xf32> to vector<2x16xf32>
    %47 = vector.shape_cast %46 : vector<2x16xf32> to vector<2x16x1xf32>
    %cst_34 = arith.constant 1.280000e+02 : f32
    %48 = vector.broadcast %cst_34 : f32 to vector<2x16x1xf32>
    %49 = arith.divf %47, %48 : vector<2x16x1xf32>
    %50 = vector.broadcast %49 : vector<2x16x1xf32> to vector<2x16x128xf32>
    %51 = arith.subf %45, %50 : vector<2x16x128xf32>
    %52 = vector.broadcast %49 : vector<2x16x1xf32> to vector<2x16x128xf32>
    %53 = arith.subf %45, %52 : vector<2x16x128xf32>
    %54 = arith.mulf %51, %53 : vector<2x16x128xf32>
    %cst_35 = arith.constant dense<0.000000e+00> : vector<2x16xf32>
    %55 = vector.multi_reduction <add>, %54, %cst_35 [2] : vector<2x16x128xf32> to vector<2x16xf32>
    %56 = vector.shape_cast %55 : vector<2x16xf32> to vector<2x16x1xf32>
    %cst_36 = arith.constant 1.280000e+02 : f32
    %57 = vector.broadcast %cst_36 : f32 to vector<2x16x1xf32>
    %58 = arith.divf %56, %57 : vector<2x16x1xf32>
    %59 = vector.broadcast %49 : vector<2x16x1xf32> to vector<2x16x128xf32>
    %60 = arith.subf %45, %59 : vector<2x16x128xf32>
    %cst_37 = arith.constant 9.99999974E-6 : f32
    %61 = vector.broadcast %cst_37 : f32 to vector<2x16x1xf32>
    %62 = arith.addf %58, %61 : vector<2x16x1xf32>
    %63 = math.rsqrt %62 : vector<2x16x1xf32>
    %64 = vector.broadcast %63 : vector<2x16x1xf32> to vector<2x16x128xf32>
    %65 = arith.mulf %60, %64 : vector<2x16x128xf32>
    %66 = vector.shape_cast %6 : vector<1x128xf32> to vector<1x1x128xf32>
    %67 = vector.broadcast %66 : vector<1x1x128xf32> to vector<2x16x128xf32>
    %68 = arith.mulf %65, %67 : vector<2x16x128xf32>
    %69 = vector.shape_cast %7 : vector<1x128xf32> to vector<1x1x128xf32>
    %70 = vector.broadcast %69 : vector<1x1x128xf32> to vector<2x16x128xf32>
    %71 = arith.addf %68, %70 : vector<2x16x128xf32>
    %72 = vector.shape_cast %71 : vector<2x16x128xf32> to vector<32x128xf32>
    %73 = arith.truncf %72 : vector<32x128xf32> to vector<32x128xbf16>
    %c0_38 = arith.constant 0 : index
    %c0_39 = arith.constant 0 : index
    %74 = vector.load %arg10[%c0_38, %c0_39] : memref<128x256xbf16, #tpu.memory_space<vmem>>, vector<128x256xbf16>
    %cst_40 = arith.constant dense<0.000000e+00> : vector<32x256xf32>
    %75 = tpu.matmul %73, %74, %cst_40 {dimension_numbers = #tpu.dot_dimension_numbers<[1], [0], [0], [1], [0, 0, 1, 1], [], []>} : vector<32x128xbf16>, vector<128x256xbf16>, vector<32x256xf32> -> vector<32x256xf32>
    %76 = vector.broadcast %8 : vector<1x256xf32> to vector<32x256xf32>
    %77 = arith.addf %75, %76 : vector<32x256xf32>
    %cst_41 = arith.constant 0.000000e+00 : f32
    %78 = vector.broadcast %cst_41 : f32 to vector<32x256xf32>
    %79 = arith.maximumf %77, %78 : vector<32x256xf32>
    %80 = arith.truncf %79 : vector<32x256xf32> to vector<32x256xbf16>
    %c0_42 = arith.constant 0 : index
    %c0_43 = arith.constant 0 : index
    %81 = vector.load %arg12[%c0_42, %c0_43] : memref<256x128xbf16, #tpu.memory_space<vmem>>, vector<256x128xbf16>
    %cst_44 = arith.constant dense<0.000000e+00> : vector<32x128xf32>
    %82 = tpu.matmul %80, %81, %cst_44 {dimension_numbers = #tpu.dot_dimension_numbers<[1], [0], [0], [1], [0, 0, 1, 1], [], []>} : vector<32x256xbf16>, vector<256x128xbf16>, vector<32x128xf32> -> vector<32x128xf32>
    %83 = vector.broadcast %9 : vector<1x128xf32> to vector<32x128xf32>
    %84 = arith.addf %82, %83 : vector<32x128xf32>
    %85 = arith.addf %72, %84 : vector<32x128xf32>
    %cst_45 = arith.constant dense<0.000000e+00> : vector<32xf32>
    %86 = vector.multi_reduction <add>, %85, %cst_45 [1] : vector<32x128xf32> to vector<32xf32>
    %87 = vector.shape_cast %86 : vector<32xf32> to vector<32x1xf32>
    %cst_46 = arith.constant 1.280000e+02 : f32
    %88 = vector.broadcast %cst_46 : f32 to vector<32x1xf32>
    %89 = arith.divf %87, %88 : vector<32x1xf32>
    %90 = vector.broadcast %89 : vector<32x1xf32> to vector<32x128xf32>
    %91 = arith.subf %85, %90 : vector<32x128xf32>
    %92 = vector.broadcast %89 : vector<32x1xf32> to vector<32x128xf32>
    %93 = arith.subf %85, %92 : vector<32x128xf32>
    %94 = arith.mulf %91, %93 : vector<32x128xf32>
    %cst_47 = arith.constant dense<0.000000e+00> : vector<32xf32>
    %95 = vector.multi_reduction <add>, %94, %cst_47 [1] : vector<32x128xf32> to vector<32xf32>
    %96 = vector.shape_cast %95 : vector<32xf32> to vector<32x1xf32>
    %cst_48 = arith.constant 1.280000e+02 : f32
    %97 = vector.broadcast %cst_48 : f32 to vector<32x1xf32>
    %98 = arith.divf %96, %97 : vector<32x1xf32>
    %99 = vector.broadcast %89 : vector<32x1xf32> to vector<32x128xf32>
    %100 = arith.subf %85, %99 : vector<32x128xf32>
    %cst_49 = arith.constant 9.99999974E-6 : f32
    %101 = vector.broadcast %cst_49 : f32 to vector<32x1xf32>
    %102 = arith.addf %98, %101 : vector<32x1xf32>
    %103 = math.rsqrt %102 : vector<32x1xf32>
    %104 = vector.broadcast %103 : vector<32x1xf32> to vector<32x128xf32>
    %105 = arith.mulf %100, %104 : vector<32x128xf32>
    %106 = vector.broadcast %10 : vector<1x128xf32> to vector<32x128xf32>
    %107 = arith.mulf %105, %106 : vector<32x128xf32>
    %108 = vector.broadcast %11 : vector<1x128xf32> to vector<32x128xf32>
    %109 = arith.addf %107, %108 : vector<32x128xf32>
    %110 = vector.shape_cast %109 : vector<32x128xf32> to vector<2x16x128xf32>
    %c0_50 = arith.constant 0 : index
    %c0_51 = arith.constant 0 : index
    %c0_52 = arith.constant 0 : index
    %111 = vector.load %arg16[%c0_50, %c0_51, %c0_52] : memref<2x16x128xf32, #tpu.memory_space<vmem>>, vector<2x16x128xf32>
    tpu.vector_store %arg16[%c0_50, %c0_51, %c0_52], %110 {strides = array<i32>} : memref<2x16x128xf32, #tpu.memory_space<vmem>>, vector<2x16x128xf32>,
    return
  }
  func.func @transform_0(%arg0: i32) -> (i32, i32, i32) {
    %c0_i32 = arith.constant 0 : i32
    %c0_i32_0 = arith.constant 0 : i32
    %c0_i32_1 = arith.constant 0 : i32
    return %arg0, %c0_i32, %c0_i32_0 : i32, i32, i32
  }
  func.func @transform_1(%arg0: i32) -> (i32, i32) {
    %c0_i32 = arith.constant 0 : i32
    %c0_i32_0 = arith.constant 0 : i32
    %c0_i32_1 = arith.constant 0 : i32
    return %c0_i32, %c0_i32_0 : i32, i32
  }
  func.func @transform_2(%arg0: i32) -> (i32, i32) {
    %c0_i32 = arith.constant 0 : i32
    %c0_i32_0 = arith.constant 0 : i32
    %c0_i32_1 = arith.constant 0 : i32
    return %c0_i32, %c0_i32_0 : i32, i32
  }
  func.func @transform_3(%arg0: i32) -> (i32, i32) {
    %c0_i32 = arith.constant 0 : i32
    %c0_i32_0 = arith.constant 0 : i32
    %c0_i32_1 = arith.constant 0 : i32
    return %c0_i32, %c0_i32_0 : i32, i32
  }
  func.func @transform_4(%arg0: i32) -> (i32, i32) {
    %c0_i32 = arith.constant 0 : i32
    %c0_i32_0 = arith.constant 0 : i32
    %c0_i32_1 = arith.constant 0 : i32
    return %c0_i32, %c0_i32_0 : i32, i32
  }
  func.func @transform_5(%arg0: i32) -> (i32, i32) {
    %c0_i32 = arith.constant 0 : i32
    %c0_i32_0 = arith.constant 0 : i32
    %c0_i32_1 = arith.constant 0 : i32
    return %c0_i32, %c0_i32_0 : i32, i32
  }
  func.func @transform_6(%arg0: i32) -> (i32, i32) {
    %c0_i32 = arith.constant 0 : i32
    %c0_i32_0 = arith.constant 0 : i32
    %c0_i32_1 = arith.constant 0 : i32
    return %c0_i32, %c0_i32_0 : i32, i32
  }
  func.func @transform_7(%arg0: i32) -> (i32, i32) {
    %c0_i32 = arith.constant 0 : i32
    %c0_i32_0 = arith.constant 0 : i32
    %c0_i32_1 = arith.constant 0 : i32
    return %c0_i32, %c0_i32_0 : i32, i32
  }
  func.func @transform_8(%arg0: i32) -> (i32, i32) {
    %c0_i32 = arith.constant 0 : i32
    %c0_i32_0 = arith.constant 0 : i32
    %c0_i32_1 = arith.constant 0 : i32
    return %c0_i32, %c0_i32_0 : i32, i32
  }
  func.func @transform_9(%arg0: i32) -> (i32, i32) {
    %c0_i32 = arith.constant 0 : i32
    %c0_i32_0 = arith.constant 0 : i32
    %c0_i32_1 = arith.constant 0 : i32
    return %c0_i32, %c0_i32_0 : i32, i32
  }
  func.func @transform_10(%arg0: i32) -> (i32, i32) {
    %c0_i32 = arith.constant 0 : i32
    %c0_i32_0 = arith.constant 0 : i32
    %c0_i32_1 = arith.constant 0 : i32
    return %c0_i32, %c0_i32_0 : i32, i32
  }
  func.func @transform_11(%arg0: i32) -> (i32, i32) {
    %c0_i32 = arith.constant 0 : i32
    %c0_i32_0 = arith.constant 0 : i32
    %c0_i32_1 = arith.constant 0 : i32
    return %c0_i32, %c0_i32_0 : i32, i32
  }
  func.func @transform_12(%arg0: i32) -> (i32, i32) {
    %c0_i32 = arith.constant 0 : i32
    %c0_i32_0 = arith.constant 0 : i32
    %c0_i32_1 = arith.constant 0 : i32
    return %c0_i32, %c0_i32_0 : i32, i32
  }
  func.func @transform_13(%arg0: i32) -> (i32, i32) {
    %c0_i32 = arith.constant 0 : i32
    %c0_i32_0 = arith.constant 0 : i32
    %c0_i32_1 = arith.constant 0 : i32
    return %c0_i32, %c0_i32_0 : i32, i32
  }
  func.func @transform_14(%arg0: i32) -> (i32, i32) {
    %c0_i32 = arith.constant 0 : i32
    %c0_i32_0 = arith.constant 0 : i32
    %c0_i32_1 = arith.constant 0 : i32
    return %c0_i32, %c0_i32_0 : i32, i32
  }
  func.func @transform_15(%arg0: i32) -> (i32, i32, i32) {
    %c0_i32 = arith.constant 0 : i32
    %c0_i32_0 = arith.constant 0 : i32
    %c0_i32_1 = arith.constant 0 : i32
    return %arg0, %c0_i32, %c0_i32_0 : i32, i32, i32
  }
}

</mosaic_0001>

<bundles_post_ra>
// kernel: tpu_custom_call.1
= control target key start
LH: loop header
LB: loop body
LE: loop exit
PB: predicated region body
PF: predicated region fallthrough
CT: control target
= control target key end

     0   :  { %s2939_s0 = inlined_call_operand.hbm [shape: f32[4,16,128], index: 0, kind: input, shape index: {}]   ;;  %s2940_s1 = inlined_call_operand.hbm [shape: bf16[128,128], index: 1, kind: input, shape index: {}]   ;;  %s2941_s2 = inlined_call_operand.vmem [shape: f32[1,128], index: 2, kind: input, shape index: {}]   ;;  %s2942_s3 = inlined_call_operand.hbm [shape: bf16[128,128], index: 3, kind: input, shape index: {}]   ;;  %s2943_s4 = inlined_call_operand.hbm [shape: f32[1,128], index: 4, kind: input, shape index: {}]   ;;  %s2944_s5 = inlined_call_operand.hbm [shape: bf16[128,128], index: 5, kind: input, shape index: {}]   ;;  %s2945_s6 = inlined_call_operand.vmem [shape: f32[1,128], index: 6, kind: input, shape index: {}]   ;;  %s2946_s7 = inlined_call_operand.vmem [shape: f32[1,128], index: 7, kind: input, shape index: {}]   ;;  %s2947_s8 = inlined_call_operand.vmem [shape: f32[1,128], index: 8, kind: input, shape index: {}]   ;;  %s2948_s9 = inlined_call_operand.hbm [shape: bf16[128,256], index: 9, kind: input, shape index: {}]   ;;  %s2949_s10 = inlined_call_operand.vmem [shape: f32[1,256], index: 10, kind: input, shape index: {}]   ;;  %s2950_s11 = inlined_call_operand.hbm [shape: bf16[256,128], index: 11, kind: input, shape index: {}]   ;;  %s2951_s12 = inlined_call_operand.vmem [shape: f32[1,128], index: 12, kind: input, shape index: {}]   ;;  %s2952_s13 = inlined_call_operand.vmem [shape: f32[1,128], index: 13, kind: input, shape index: {}]   ;;  %s2953_s14 = inlined_call_operand.vmem [shape: f32[1,128], index: 14, kind: input, shape index: {}]   ;;  %s2954_s15 = inlined_call_operand.hbm [shape: f32[4,16,128], index: 15, kind: output, shape index: {}]  }
   0x1   :  { %2958 = sst [smem:[#allocation21_spill]] %s2940_s1 }
   0x2   :  { %2959 = sst [smem:[#allocation22_spill]] %s2942_s3 }
   0x3   :  { %2960 = sst [smem:[#allocation23_spill]] %s2943_s4 }
   0x4   :  { %2961 = sst [smem:[#allocation24_spill]] %s2944_s5 }
   0x5   :  { %2962 = sst [smem:[#allocation25_spill]] %s2948_s9 }
   0x6   :  { %2963 = sst [smem:[#allocation26_spill]] %s2950_s11 }
   0x7   :  { %2964 = sst [smem:[#allocation27_spill]] %s2952_s13 }
   0x8   :  { %2965 = sst [smem:[#allocation28_spill]] %s2953_s14 }
   0x9   :  { %2966 = sst [smem:[#allocation29_spill]] %s2954_s15 }
   0xa   :  { %20 = vsyncpa [#allocation3], 0 }
   0xb   :  { %22 = vsyncpa [#allocation3 + $0x1], 0 }
   0xc   :  { %23 = vsyncpa [#allocation6], 0 }
   0xd   :  { %24 = vsyncpa [#allocation9], 0 }
   0xe   :  { %25 = vsyncpa [#allocation12], 0 }
   0xf   :  { %26 = vsyncpa [#allocation4], 0 }
  0x10   :  { %28 = vsyncpa [#allocation4 + $0x1], 0  ;;  %s2599_s18 = smov 0   ;;  %s2601_s19 = smov 0  }
  0x11   :  { %s2603_s20 = smov 0   ;;  %s2605_s21 = smov 0  }
  0x12 LB: > { %s2967_s1 = sld [smem:[#allocation21_spill]]  ;;  %s2623_s25 = sadd.s32 4294967295, %s2504_s21   ;;  %s2504_s21 = sphi %s2605_s21, %s2991_s21   ;;  %s2500_s20 = sphi %s2603_s20, %s2990_s20   ;;  %s2496_s19 = sphi %s2601_s19, %s2989_s19   ;;  %s2492_s18 = sphi %s2599_s18, %s2988_s18  }
  0x13   : > { %p1739_p0 = scmp.ge.s32.totalorder %s2504_s21, 1  ;;  %p55_p1 = scmp.eq.s32.totalorder %s2623_s25, 0 }
  0x14   : > { %p385_p2 = scmp.lt.s32.totalorder %s2504_s21, 3  ;;  %s2506_s27 = smov [#allocation5]  }
  0x15   : > { %s398_s28 = sshll.u32 %s2506_s27, 4  ;;  %s2969_s4 = sld [smem:[#allocation23_spill]]  ;;  %s399_s28 = int_to_ptr.vmem [resolvable:$true] %s398_s28 }
  0x16   : > { %p2628_p3 = pnand %p1739_p0, %p385_p2  ;;  %s2971_s9 = sld [smem:[#allocation25_spill]] }
  0x17   : > { %s2508_s14 = smov 64   ;;  %s2509_s13 = smov 4  }
  0x18   : > { %s396_s24 = sshll.u32 %s2967_s1, 4  ;;  %p2088_p4 = pneg %p2628_p3  ;;  %s397_s24 = int_to_ptr.hbm [resolvable:$true] %s396_s24 }
  0x19   : > { %s2507_s1 = smov [#allocation8]   ;;  %s2510_s29 = smov [#allocation11]  }
  0x1a   : > { %p2640_p6 = pnand %p2088_p4, %p55_p1  ;;  %s430_s15 = sshll.u32 %s2507_s1, 4  ;;  %s431_s15 = int_to_ptr.vmem [resolvable:$true] %s430_s15 }
  0x1b   : > { %s428_s16 = sshll.u32 %s2969_s4, 4  ;;  %s464_s30 = sshll.u32 %s2510_s29, 4  ;;  %s429_s16 = int_to_ptr.hbm [resolvable:$true] %s428_s16  ;;  %s465_s30 = int_to_ptr.vmem [resolvable:$true] %s464_s30 }
  0x1c   : > { %s462_s27 = sshll.u32 %s2971_s9, 4  ;;  %s2972_s3 = sld [smem:[#allocation22_spill]]  ;;  %s463_s27 = int_to_ptr.hbm [resolvable:$true] %s462_s27 }
  0x1d   : > { %2091 = dma.hbm_to_vmem [thread:$0]  (!%p2640_p6), %s397_s24, 1024, %s399_s28, [#allocation6], %s2508_s14, %s2508_s14, %s2509_s13  }
  0x1e   : > { %2097 = dma.hbm_to_vmem [thread:$0]  (!%p2640_p6), %s429_s16, 16, %s431_s15, [#allocation9]  }
  0x1f   : > { %s2956_s1 = smov 128   ;;  %s2957_s9 = smov 8  }
  0x20   : > { %2103 = dma.hbm_to_vmem [thread:$0]  (!%p2640_p6), %s463_s27, 2048, %s465_s30, [#allocation12], %s2956_s1, %s2956_s1, %s2957_s9  }
  0x21   : > { %s2513_s24 = smov [#allocation7]   ;;  %s2973_s5 = sld [smem:[#allocation24_spill]] }
  0x22   : > { %s413_s4 = sshll.u32 %s2972_s3, 4  ;;  %s415_s15 = sshll.u32 %s2513_s24, 4  ;;  %s414_s4 = int_to_ptr.hbm [resolvable:$true] %s413_s4  ;;  %s416_s15 = int_to_ptr.vmem [resolvable:$true] %s415_s15 }
  0x23   : > { %2094 = dma.hbm_to_vmem [thread:$0]  (!%p2640_p6), %s414_s4, 1024, %s416_s15, [#allocation6], %s2508_s14, %s2508_s14, %s2509_s13  }
  0x24   : > { %s2974_s11 = sld [smem:[#allocation26_spill]]  ;;  %s2514_s23 = smov [#allocation10]  }
  0x25   : > { %s441_s24 = sshll.u32 %s2514_s23, 4  ;;  %s2515_s4 = smov [#allocation13]   ;;  %s442_s24 = int_to_ptr.vmem [resolvable:$true] %s441_s24 }
  0x26   : > { %s481_s15 = sshll.u32 %s2515_s4, 4  ;;  %s1738_s28 = sadd.s32 4294967294, %s2504_s21   ;;  %s482_s15 = int_to_ptr.vmem [resolvable:$true] %s481_s15 }
  0x27   : > { %s439_s29 = sshll.u32 %s2973_s5, 4  ;;  %s2685_s16 = sadd.s32 1, %s2504_s21   ;;  %s440_s29 = int_to_ptr.hbm [resolvable:$true] %s439_s29 }
  0x28   : > { %2100 = dma.hbm_to_vmem [thread:$0]  (!%p2640_p6), %s440_s29, 1024, %s442_s24, [#allocation9], %s2508_s14, %s2508_s14, %s2509_s13  }
  0x29   : > { %s38_s27 = ssub.s32 %s2504_s21, %s2685_s16  ;;  %s41_s30 = sadd.s32 1, %s2500_s20 }
  0x2a   : > { %s479_s22 = sshll.u32 %s2974_s11, 4  ;;  %p39_p7 = scmp.eq.s32.totalorder %s38_s27, 0  ;;  %s480_s22 = int_to_ptr.hbm [resolvable:$true] %s479_s22 }
  0x2b   : > { %2106 = dma.hbm_to_vmem [thread:$0]  (!%p2640_p6), %s480_s22, 2048, %s482_s15, [#allocation12], %s2508_s14, %s2508_s14, %s2509_s13  }
  0x2c   : > { %p48_p8 = scmp.ne.s32.totalorder %s2500_s20, %s2496_s19  ;;  %p49_p9 = scmp.eq.s32.totalorder %s2504_s21, 0 }
  0x2d   : > { %p54_p10 = scmp.ne.s32.totalorder %s2496_s19, %s2492_s18  ;;  %p372_p13 = scmp.eq.s32.totalorder %s2623_s25, 1 }
  0x2e   : > { %s2696_s29 = scalar_select %p39_p7, %s2500_s20, %s41_s30  }
  0x2f   : > { %p2698_p11 = por %p49_p9, %p48_p8  ;;  %p2704_p12 = por %p55_p1, %p54_p10 }
  0x30   : > { %2975 = sst [smem:[#allocation20_spill]] %s2696_s29  ;;  %p378_p0 = scmp.eq.s32.totalorder %s1738_s28, 1 }
  0x31   : > { %p2121_p2 = scmp.lt.s32.totalorder %s2504_s21, 2  ;;  %s504_s14 = sand.u32 1, %s2500_s20  }
  0x32   : > { %p2711_p4 = por %p372_p13, %p48_p8  ;;  %p2715_p6 = por %p378_p0, %p54_p10 }
  0x33   : > { %s1747_s24 = sshll.u32 %s504_s14, 5  ;;  %s1993_s4 = sshll.u32 %s2504_s21, 5 }
  0x34   : > { %s514_s30 = scalar_lea.hbm %s2939_s0, %s1993_s4  ;;  %s508_s1 = scalar_lea.vmem [#allocation2], %s1747_s24 }
  0x35   : > { %s517_s9 = sshll.u32 %s508_s1, 4  ;;  %s515_s3 = sshll.u32 %s514_s30, 4  ;;  %s518_s9 = int_to_ptr.vmem [resolvable:$true] %s517_s9  ;;  %s516_s3 = int_to_ptr.hbm [resolvable:$true] %s515_s3 }
  0x36   : > { %p2725_p7 = pnand %p2121_p2, %p2698_p11  ;;  %s505_s5 = scalar_lea.sflag [#allocation3], %s504_s14 }
  0x37   : > { %s2396_s11 = sshra.s32 %s516_s3, 4  ;;  %s2403_s4 = scalar_lea.hbm %s2939_s0, 64  ;;  %s2397_s11 = int_to_ptr.hbm [resolvable:$true] %s2396_s11 }
  0x38   : > { %s2398_s29 = scalar_lea.hbm %s2397_s11, 32  ;;  %p2400_p9 = pneg %p2725_p7 }
  0x39   : > { %p2399_p8 = scmp.ne.s32.totalorder %s2397_s11, %s2398_s29  ;;  %p2404_p11 = scmp.lt.s32.totalorder %s2397_s11, %s2939_s0 }
  0x3a   : > { %p2405_p0 = scmp.lt.s32.totalorder %s2403_s4, %s2398_s29 }
  0x3b   : > { %p2401_p10 = pnand %p2400_p9, %p2399_p8 }
  0x3c   : > { %p2406_p2 = por %p2405_p0, %p2404_p11 }
  0x3d   : > { %p2402_p13 = pneg %p2401_p10 }
  0x3f   : > { %p2407_p5 = pnand %p2406_p2, %p2402_p13 }
  0x41   : > { %2410 = shalt.err (!%p2407_p5)
}
  0x42   : > { %s2981_s14 = smov 8   ;;  %s2982_s27 = smov 128  }
  0x43   : > { %2110 = dma.hbm_to_vmem [thread:$0]  (!%p2725_p7), %s516_s3, 512, %s518_s9, %s505_s5, %s2982_s27, %s2982_s27, %s2981_s14  }
  0x44   : > { %529 = sbr.rel (%p2628_p3) target bundleno = 1645 (0x66d), region = 80  ;;  %s2745_s30 = sand.u32 (!%p2628_p3), 1, %s2496_s19  }
  0x45   : > { %s1752_s11 = sshll.u32 (!%p2628_p3), %s2745_s30, 5  ;;  %s532_s29 = scalar_lea.sflag (!%p2628_p3), [#allocation3], %s2745_s30 }
  0x46   : > { %s2751_s24 = scalar_lea.vmem (!%p2628_p3), [#allocation2], %s1752_s11 }
  0x49   : > { %2471 = dma.done.wait (%p2704_p12), %s532_s29, 512  }
  0x4a   : > { %2473 = vsyncadd (%p2704_p12), %s532_s29, 4294966784 }
  0x4b   : > { %2475 = dma.done.wait (%p55_p1), [#allocation6], 2048  }
  0x4c   : > { %2477 = vsyncadd (%p55_p1), [#allocation6], 4294965248 }
  0x4d   : > { %2479 = dma.done.wait (%p55_p1), [#allocation9], 1040  }
  0x4e   : > { %2481 = vsyncadd (%p55_p1), [#allocation9], 4294966256 }
  0x4f   : > { %2483 = dma.done.wait (%p55_p1), [#allocation12], 4096  }
  0x50   : > { %2485 = vsyncadd (%p55_p1), [#allocation12], 4294963200  ;;  %v2009_v0 = vld [vmem:[#allocation7 + $0x38] sm:$0xff]  ;;  %v2008_v2 = vld [vmem:[#allocation7 + $0x30] sm:$0xff]  ;;  %vm957_vm0 = vcmask 130048   ;;  %s2983_s3 = sld [smem:[#allocation27_spill]] }
  0x51   : > { %v2001_v1 = vld [vmem:[#allocation5 + $0x38] sm:$0xff]  ;;  %784 = vmatpush.bf16.msra.mxu1 %v2009_v0  ;;  %v2000_v3 = vld [vmem:[#allocation5 + $0x30] sm:$0xff]  ;;  %v2007_v4 = vld [vmem:[#allocation7 + $0x28] sm:$0xff]  ;;  %s2984_s26 = sld [smem:[#allocation28_spill]]  ;;  %s2897_s13 = scalar_lea.vmem [#allocation14], %s1752_s11 }
  0x52   : > { %698 = vmatpush.bf16.msra.mxu0 %v2001_v1  ;;  %v1999_v5 = vld [vmem:[#allocation5 + $0x28] sm:$0xff]  ;;  %v2006_v6 = vld [vmem:[#allocation7 + $0x20] sm:$0xff]  ;;  %v2005_v8 = vld [vmem:[#allocation7 + $0x18] sm:$0xff]  ;;  %s2051_s11 = sshll.u32 %s2623_s25, 5  ;;  %s2985_s4 = sld [smem:[#allocation29_spill]] }
  0x53   : > { %v1998_v7 = vld [vmem:[#allocation5 + $0x20] sm:$0xff]  ;;  %v1997_v9 = vld [vmem:[#allocation5 + $0x18] sm:$0xff]  ;;  %v2004_v10 = vld [vmem:[#allocation7 + $0x10] sm:$0xff]  ;;  %s1605_s17 = sshll.u32 %s2897_s13, 4  ;;  %s1592_s25 = scalar_lea.sflag [#allocation4], %s2745_s30  ;;  %s1606_s17 = int_to_ptr.vmem [resolvable:$true] %s1605_s17 }
  0x54   : > { %v1996_v11 = vld [vmem:[#allocation5 + $0x10] sm:$0xff]  ;;  %v2003_v12 = vld [vmem:[#allocation7 + $0x8] sm:$0xff]  ;;  %v2002_v14 = vld [vmem:[#allocation7] sm:$0xff] }
  0x55   : > { %785 = vmatpush.bf16.msra.mxu1 %v2008_v2  ;;  %v1995_v13 = vld [vmem:[#allocation5 + $0x8] sm:$0xff]  ;;  %v2770_v15 = vld [vmem:[%s2751_s24] sm:$0xff]  ;;  %v2782_v19 = vld [vmem:[%s2751_s24 + $0x10] sm:$0xff] }
  0x56   : > { %699 = vmatpush.bf16.msra.mxu0 %v2000_v3  ;;  %v2773_v16 = vld [vmem:[%s2751_s24 + $0x8] sm:$0xff]  ;;  %v1994_v17 = vld [vmem:[#allocation5] sm:$0xff]  ;;  %v2785_v20 = vld [vmem:[%s2751_s24 + $0x18] sm:$0xff] }
  0x57   : > { %v2777_v18 = vpack.c.bf16 %v2773_v16, %v2770_v15  ;;  %v2789_v21 = vpack.c.bf16 %v2785_v20, %v2782_v19  ;;  %v2174_v24 = vld [vmem:[#allocation8] ss:$0 sm:$0xff]  ;;  %v2016_v61 = vld [vmem:[#allocation10 + $0x30] sm:$0xff]  ;;  %v2015_v0 = vld [vmem:[#allocation10 + $0x28] sm:$0xff] }
  0x58   : > { %v2175_v26 = vld [vmem:[%s2941_s2] ss:$0 sm:$0xff]  ;;  %v2014_v2 = vld [vmem:[#allocation10 + $0x20] sm:$0xff]  ;;  %s1604_s15 = scalar_lea.hbm %s2985_s4, %s2051_s11  ;;  %s2446_s5 = scalar_lea.hbm %s2985_s4, 64 }
  0x59   : > { %786 = vmatpush.bf16.msra.mxu1 %v2007_v4  ;;  %v2017_v60 = vld [vmem:[#allocation10 + $0x38] sm:$0xff]  ;;  %s1607_s14 = sshll.u32 %s1604_s15, 4  ;;  %s1608_s14 = int_to_ptr.hbm [resolvable:$true] %s1607_s14 }
  0x5a   : > { %700 = vmatpush.bf16.msra.mxu0 %v1999_v5  ;;  %870 = vmatpush.bf16.msra.mxu2 %v2017_v60  ;;  %v2013_v5 = vld [vmem:[#allocation10 + $0x18] sm:$0xff]  ;;  %s2440_s27 = sshra.s32 %s1608_s14, 4  ;;  %s2441_s27 = int_to_ptr.hbm [resolvable:$true] %s2440_s27 }
  0x5b   : > { %s2442_s29 = scalar_lea.hbm %s2441_s27, 32  ;;  %p2447_p12 = scmp.lt.s32.totalorder %s2441_s27, %s2985_s4 }
  0x5c   : > { %p2443_p1 = scmp.ne.s32.totalorder %s2441_s27, %s2442_s29  ;;  %p2448_p7 = scmp.lt.s32.totalorder %s2446_s5, %s2442_s29 }
  0x5d   : > { %787 = vmatpush.bf16.msra.mxu1 %v2006_v6 }
  0x5e   : > { %701 = vmatpush.bf16.msra.mxu0 %v1998_v7  ;;  %871 = vmatpush.bf16.msra.mxu2 %v2016_v61  ;;  %v2012_v7 = vld [vmem:[#allocation10 + $0x10] sm:$0xff]  ;;  %p2444_p3 = pnand %p2443_p1, %p2711_p4  ;;  %p2449_p8 = por %p2448_p7, %p2447_p12 }
  0x60   : > { %p2445_p5 = pneg %p2444_p3 }
  0x61   : > { %788 = vmatpush.bf16.msra.mxu1 %v2005_v8 }
  0x62   : > { %702 = vmatpush.bf16.msra.mxu0 %v1997_v9  ;;  %872 = vmatpush.bf16.msra.mxu2 %v2015_v0  ;;  %p2450_p9 = pnand %p2449_p8, %p2445_p5 }
  0x65   : > { %789 = vmatpush.bf16.msra.mxu1 %v2004_v10  ;;  %v2011_v10 = vld [vmem:[#allocation10 + $0x8] sm:$0xff] }
  0x66   : > { %703 = vmatpush.bf16.msra.mxu0 %v1996_v11  ;;  %873 = vmatpush.bf16.msra.mxu2 %v2014_v2 }
  0x69   : > { %790 = vmatpush.bf16.msra.mxu1 %v2003_v12  ;;  %v2010_v12 = vld [vmem:[#allocation10] sm:$0xff] }
  0x6a   : > { %704 = vmatpush.bf16.msra.mxu0 %v1995_v13  ;;  %874 = vmatpush.bf16.msra.mxu2 %v2013_v5 }
  0x6d   : > { %791 = vmatpush.bf16.msra.mxu1 %v2002_v14 }
  0x6e   : > { %705 = vmatpush.bf16.msra.mxu0 %v1994_v17  ;;  %875 = vmatpush.bf16.msra.mxu2 %v2012_v7 }
  0x70   : > { %792 = vmatmul.bf16.vlgmr.msra.gmra.mxu1 %v2777_v18 }
  0x71   : > { %706 = vmatmul.bf16.vlgmr.msra.gmra.mxu0 %v2777_v18 }
  0x72   : > { %876 = vmatpush.bf16.msra.mxu2 %v2011_v10 }
  0x76   : > { %877 = vmatpush.bf16.msra.mxu2 %v2010_v12 }
  0x79   : > { %878 = vmatmul.bf16.vlgmr.msra.gmra.mxu2 %v2777_v18 }
  0x80   : > { %797 = vmatmul.bf16.gmra.mxu1 %v2789_v21 }
  0x81   : > { %711 = vmatmul.bf16.gmra.mxu0 %v2789_v21 }
  0x89   : > { %883 = vmatmul.bf16.gmra.mxu2 %v2789_v21 }
  0xed   : > { %v793_v22 = vpop.f32.mrf.mxu1 }
  0xee   : > { %v707_v23 = vpop.f32.mrf.mxu0  ;;  %v794_v25 = vadd.f32 %v2174_v24, %v793_v22 }
  0xef   : > { %v708_v31 = vadd.f32 %v2175_v26, %v707_v23 }
  0xf0   : > { %v893_v29 = vpack.c.bf16 %v794_v25, %v794_v25 }
  0xf1   : > { %v889_v36 = vpack.c.bf16 %v708_v31, %v708_v31 }
  0xf2   : > { %v909_v34 = vunpack.c.l.b16 %v893_v29 }
  0xf3   : > { %v903_v41 = vunpack.c.l.b16 %v889_v36 }
  0xf5   : > { %v795_v27 = vpop.f32.mrf.mxu1 }
  0xf6   : > { %v709_v28 = vpop.f32.mrf.mxu0  ;;  %v796_v30 = vadd.f32 %v2174_v24, %v795_v27 }
  0xf7   : > { %v710_v32 = vadd.f32 %v2175_v26, %v709_v28 }
  0xf8   : > { %v894_v33 = vpack.c.bf16 %v796_v30, %v796_v30 }
  0xf9   : > { %v890_v37 = vpack.c.bf16 %v710_v32, %v710_v32 }
  0xfa   : > { %v910_v35 = vunpack.c.l.b16 %v894_v33 }
  0xfb   : > { %v904_v42 = vunpack.c.l.b16 %v890_v37 }
  0xfc   : > { %v911_v38 = vpack.c.b16 %v910_v35, %v909_v34 }
  0xfd   : > { %v798_v39 = vpop.f32.mrf.mxu1  ;;  %v905_v44 = vpack.c.b16 %v904_v42, %v903_v41  ;;  %v879_v41 = vpop.f32.mrf.mxu2 }
  0xfe   : > { %v712_v40 = vpop.f32.mrf.mxu0  ;;  %920 = vmatpush.bf16.xpose.msra.mxu3 %v911_v38  ;;  %v799_v43 = vadd.f32 %v2174_v24, %v798_v39 }
  0xff   : > { %v713_v49 = vadd.f32 %v2175_v26, %v712_v40  ;;  %v2176_v40 = vld [vmem:[%s2945_s6] ss:$0 sm:$0xff] }
 0x100   : > { %v895_v47 = vpack.c.bf16 %v799_v43, %v799_v43  ;;  %v880_v42 = vadd.f32 %v2176_v40, %v879_v41 }
 0x101   : > { %v891_v54 = vpack.c.bf16 %v713_v49, %v713_v49 }
 0x102   : > { %v935_v52 = vunpack.c.l.b16 %v895_v47  ;;  %v897_v43 = vpack.c.bf16 %v880_v42, %v880_v42 }
 0x103   : > { %v929_v57 = vunpack.c.l.b16 %v891_v54 }
 0x105   : > { %v800_v45 = vpop.f32.mrf.mxu1  ;;  %921 = vmatmul.bf16.vlgmr.msra.gmra.mxu3 %v905_v44  ;;  %v881_v44 = vpop.f32.mrf.mxu2 }
 0x106   : > { %v714_v46 = vpop.f32.mrf.mxu0  ;;  %v801_v48 = vadd.f32 %v2174_v24, %v800_v45  ;;  %v882_v45 = vadd.f32 %v2176_v40, %v881_v44 }
 0x107   : > { %v715_v50 = vadd.f32 %v2175_v26, %v714_v46  ;;  %v1013_v46 = vunpack.c.l.b16 %v897_v43 }
 0x108   : > { %v896_v51 = vpack.c.bf16 %v801_v48, %v801_v48  ;;  %v898_v47 = vpack.c.bf16 %v882_v45, %v882_v45 }
 0x109   : > { %v892_v55 = vpack.c.bf16 %v715_v50, %v715_v50 }
 0x10a   : > { %v936_v53 = vunpack.c.l.b16 %v896_v51  ;;  %v1014_v48 = vunpack.c.l.b16 %v898_v47 }
 0x10b   : > { %v930_v58 = vunpack.c.l.b16 %v892_v55 }
 0x10c   : > { %v937_v56 = vpack.c.b16 %v936_v53, %v935_v52  ;;  %v1015_v49 = vpack.c.b16 %v1014_v48, %v1013_v46  ;;  %v1916_v48 = vld [vmem:[#allocation11 + $0x70] sm:$0xf] }
 0x10d   : > { %v931_v59 = vpack.c.b16 %v930_v58, %v929_v57  ;;  %v884_v50 = vpop.f32.mrf.mxu2 }
 0x10e   : > { %946 = vmatpush.bf16.xpose.msrb.mxu3 %v937_v56  ;;  %v885_v51 = vadd.f32 %v2176_v40, %v884_v50  ;;  %v2032_v50 = vld [vmem:[#allocation11 + $0x74] sm:$0xf] }
 0x110   : > { %v899_v52 = vpack.c.bf16 %v885_v51, %v885_v51 }
 0x112   : > { %v1041_v55 = vunpack.c.l.b16 %v899_v52  ;;  %v1918_v52 = vld [vmem:[#allocation11 + $0x78] sm:$0xf0] }
 0x115   : > { %947 = vmatmul.bf16.vlgmr.msrb.gmra.mxu3 %v931_v59  ;;  %v886_v53 = vpop.f32.mrf.mxu2 }
 0x116   : > { %1027 = vmatpush.bf16.msra.mxu3 %v1015_v49  ;;  %v887_v54 = vadd.f32 %v2176_v40, %v886_v53  ;;  %v2033_v49 = vld [vmem:[#allocation11 + $0x74] sm:$0xf0]  ;;  %v1921_v53 = vor.u32 %v2032_v50, %v1918_v52 }
 0x117   : > { %v1917_v51 = vor.u32 %v2033_v49, %v1916_v48 }
 0x118   : > { %v900_v56 = vpack.c.bf16 %v887_v54, %v887_v54  ;;  %1289 = vmatpush.bf16.msrb.mxu1 %v1921_v53  ;;  %v1908_v54 = vld [vmem:[#allocation11 + $0x60] sm:$0xf] }
 0x119   : > { %1270 = vmatpush.bf16.msrb.mxu0 %v1917_v51 }
 0x11a   : > { %v1042_v57 = vunpack.c.l.b16 %v900_v56  ;;  %v2030_v56 = vld [vmem:[#allocation11 + $0x64] sm:$0xf] }
 0x11c   : > { %v1043_v58 = vpack.c.b16 %v1042_v57, %v1041_v55  ;;  %v2031_v55 = vld [vmem:[#allocation11 + $0x64] sm:$0xf0] }
 0x11d   : > { %v1909_v57 = vor.u32 %v2031_v55, %v1908_v54  ;;  %v2041_v55 = vld [vmem:[#allocation13 + $0x38] sm:$0xff] }
 0x11e   : > { %1055 = vmatpush.bf16.msrb.mxu3 %v1043_v58  ;;  %v1910_v58 = vld [vmem:[#allocation11 + $0x68] sm:$0xf0]  ;;  %1451 = vmatpush.bf16.msrb.mxu2 %v2041_v55 }
 0x11f   : > { %1271 = vmatpush.bf16.msrb.mxu0 %v1909_v57 }
 0x188   : > { %v922_v62 = vpop.f32.mrf.mxu3 }
 0x189   : > { %v953_v63 = vmul.f32 0.088388346, %v922_v62 }
 0x18b   : > { %v958_v1 = vsel %vm957_vm0, %v953_v63, -inf }
 0x18c   : > { %959 = vmax.xlane.f32.xlu0 %v958_v1 }
 0x190   : > { %v924_v3 = vpop.f32.mrf.mxu3 }
 0x191   : > { %v954_v4 = vmul.f32 0.088388346, %v924_v3 }
 0x193   : > { %v961_v6 = vsel %vm957_vm0, %v954_v4, -inf }
 0x194   : > { %962 = vmax.xlane.f32.xlu0 %v961_v6 }
 0x198   : > { %v948_v8 = vpop.f32.mrf.mxu3 }
 0x199   : > { %v955_v9 = vmul.f32 0.088388346, %v948_v8 }
 0x19b   : > { %v964_v11 = vsel %vm957_vm0, %v955_v9, -inf }
 0x19c   : > { %965 = vmax.xlane.f32.xlu1 %v964_v11 }
 0x1a0   : > { %v950_v13 = vpop.f32.mrf.mxu3 }
 0x1a1   : > { %v956_v14 = vmul.f32 0.088388346, %v950_v13 }
 0x1a3   : > { %v967_v17 = vsel %vm957_vm0, %v956_v14, -inf }
 0x1a4   : > { %968 = vmax.xlane.f32.xlu1 %v967_v17 }
 0x1ff   : > { %v960_v22 = vpop.xlane.xlu0 %959 }
 0x200   : > { %v970_v23 = vsub.f32 %v953_v63, %v960_v22 }
 0x202   : > { %v974_v24 = vmul.f32 1.442695, %v970_v23 }
 0x204   : > { %2182 = vpow2.f32 %v974_v24 }
 0x207   : > { %v963_v25 = vpop.xlane.xlu0 %962 }
 0x208   : > { %v971_v26 = vsub.f32 %v954_v4, %v963_v25 }
 0x20a   : > { %v2183_v27 = vpop.eup %2182  ;;  %v976_v28 = vmul.f32 1.442695, %v971_v26 }
 0x20b   : > { %v982_v29 = vsel %vm957_vm0, %v2183_v27, 0.0 }
 0x20c   : > { %2184 = vpow2.f32 %v976_v28  ;;  %983 = vadd.xlane.f32.xlu2 %v982_v29 }
 0x20f   : > { %v966_v30 = vpop.xlane.xlu1 %965 }
 0x210   : > { %v972_v31 = vsub.f32 %v955_v9, %v966_v30 }
 0x212   : > { %v2185_v32 = vpop.eup %2184  ;;  %v978_v33 = vmul.f32 1.442695, %v972_v31  ;;  %v2516_v31 = vmov 128.0  }
 0x213   : > { %v985_v18 = vsel %vm957_vm0, %v2185_v32, 0.0 }
 0x214   : > { %2186 = vpow2.f32 %v978_v33  ;;  %986 = vadd.xlane.f32.xlu2 %v985_v18 }
 0x217   : > { %v969_v21 = vpop.xlane.xlu1 %968 }
 0x218   : > { %v973_v34 = vsub.f32 %v956_v14, %v969_v21 }
 0x21a   : > { %v2187_v35 = vpop.eup %2186  ;;  %v980_v36 = vmul.f32 1.442695, %v973_v34 }
 0x21b   : > { %v988_v37 = vsel %vm957_vm0, %v2187_v35, 0.0 }
 0x21c   : > { %2188 = vpow2.f32 %v980_v36  ;;  %989 = vadd.xlane.f32.xlu0 %v988_v37 }
 0x222   : > { %v2189_v38 = vpop.eup %2188 }
 0x223   : > { %v991_v39 = vsel %vm957_vm0, %v2189_v38, 0.0 }
 0x224   : > { %992 = vadd.xlane.f32.xlu1 %v991_v39 }
 0x27f   : > { %v984_v59 = vpop.xlane.xlu2 %983 }
 0x280   : > { %2190 = vrcp.f32 %v984_v59  ;;  %v1913_v59 = vor.u32 %v2030_v56, %v1910_v58  ;;  %v2049_v56 = vld [vmem:[#allocation13 + $0x78] sm:$0xff] }
 0x282   : > { %1290 = vmatpush.bf16.msrb.mxu1 %v1913_v59 }
 0x286   : > { %v2191_v61 = vpop.eup %2190 }
 0x287   : > { %v987_v60 = vpop.xlane.xlu2 %986  ;;  %v998_v62 = vmul.f32 %v2191_v61, %v2183_v27  ;;  %v2029_v61 = vld [vmem:[#allocation11 + $0x54] sm:$0xf0] }
 0x288   : > { %2192 = vrcp.f32 %v987_v60  ;;  %v1900_v60 = vld [vmem:[#allocation11 + $0x50] sm:$0xf] }
 0x289   : > { %v1002_v0 = vpack.c.bf16 %v998_v62, %v998_v62  ;;  %v2028_v62 = vld [vmem:[#allocation11 + $0x54] sm:$0xf] }
 0x28b   : > { %v1008_v4 = vunpack.c.l.b16 %v1002_v0  ;;  %v1902_v0 = vld [vmem:[#allocation11 + $0x58] sm:$0xf0] }
 0x28e   : > { %v2193_v63 = vpop.eup %2192 }
 0x28f   : > { %v999_v1 = vmul.f32 %v2193_v63, %v2185_v32  ;;  %v990_v2 = vpop.xlane.xlu0 %989  ;;  %v1901_v63 = vor.u32 %v2029_v61, %v1900_v60  ;;  %v2040_v61 = vld [vmem:[#allocation13 + $0x30] sm:$0xff] }
 0x290   : > { %2194 = vrcp.f32 %v990_v2  ;;  %v1892_v2 = vld [vmem:[#allocation11 + $0x40] sm:$0xf]  ;;  %1452 = vmatpush.bf16.msrb.mxu2 %v2040_v61 }
 0x291   : > { %v1003_v3 = vpack.c.bf16 %v999_v1, %v999_v1  ;;  %v1905_v1 = vor.u32 %v2028_v62, %v1902_v0  ;;  %1272 = vmatpush.bf16.msrb.mxu0 %v1901_v63  ;;  %v2048_v62 = vld [vmem:[#allocation13 + $0x70] sm:$0xff] }
 0x293   : > { %v1009_v5 = vunpack.c.l.b16 %v1003_v3  ;;  %1291 = vmatpush.bf16.msrb.mxu1 %v1905_v1  ;;  %v2027_v3 = vld [vmem:[#allocation11 + $0x44] sm:$0xf0] }
 0x295   : > { %v1010_v6 = vpack.c.b16 %v1009_v5, %v1008_v4  ;;  %v2026_v4 = vld [vmem:[#allocation11 + $0x44] sm:$0xf]  ;;  %v1893_v5 = vor.u32 %v2027_v3, %v1892_v2  ;;  %v2177_v3 = vld [vmem:[%s2946_s7] ss:$0 sm:$0xff] }
 0x296   : > { %v2195_v8 = vpop.eup %2194 }
 0x297   : > { %1856 = vmatmul.msk.bf16.vlgmr.msra.gmra.mxu3 %vm957_vm0, %v1010_v6  ;;  %v993_v7 = vpop.xlane.xlu1 %992  ;;  %v1000_v9 = vmul.f32 %v2195_v8, %v2187_v35  ;;  %v1894_v6 = vld [vmem:[#allocation11 + $0x48] sm:$0xf0]  ;;  %1273 = vmatpush.bf16.msrb.mxu0 %v1893_v5  ;;  %v1884_v8 = vld [vmem:[#allocation11 + $0x30] sm:$0xf] }
 0x298   : > { %2196 = vrcp.f32 %v993_v7  ;;  %v1897_v7 = vor.u32 %v2026_v4, %v1894_v6  ;;  %2052 = vmatpush.bf16.msra.mxu3 %v2049_v56  ;;  %v2039_v6 = vld [vmem:[#allocation13 + $0x28] sm:$0xff] }
 0x299   : > { %v1004_v11 = vpack.c.bf16 %v1000_v9, %v1000_v9  ;;  %2198 = vrcp.f32 %v2516_v31  ;;  %v2025_v9 = vld [vmem:[#allocation11 + $0x34] sm:$0xf0]  ;;  %1453 = vmatpush.bf16.msrb.mxu2 %v2039_v6 }
 0x29a   : > { %1292 = vmatpush.bf16.msrb.mxu1 %v1897_v7  ;;  %v2047_v7 = vld [vmem:[#allocation13 + $0x68] sm:$0xff] }
 0x29b   : > { %v1036_v14 = vunpack.c.l.b16 %v1004_v11  ;;  %v1885_v11 = vor.u32 %v2025_v9, %v1884_v8 }
 0x29c   : > { %2053 = vmatpush.bf16.msra.mxu3 %v2048_v62 }
 0x29d   : > { %1274 = vmatpush.bf16.msrb.mxu0 %v1885_v11  ;;  %v2178_v11 = vld [vmem:[%s2947_s8] ss:$0 sm:$0xff] }
 0x29e   : > { %v2197_v10 = vpop.eup %2196 }
 0x29f   : > { %v1001_v12 = vmul.f32 %v2197_v10, %v2189_v38  ;;  %v2199_v32 = vpop.eup %2198  ;;  %v2024_v10 = vld [vmem:[#allocation11 + $0x34] sm:$0xf] }
 0x2a0   : > { %v1075_v33 = vmul.f32 128.0, %v2199_v32  ;;  %vm1079_vm1 = vweird.f32 %v2199_v32  ;;  %2054 = vmatpush.bf16.msra.mxu3 %v2047_v7 }
 0x2a1   : > { %v1005_v13 = vpack.c.bf16 %v1001_v12, %v1001_v12  ;;  %v1886_v12 = vld [vmem:[#allocation11 + $0x38] sm:$0xf0] }
 0x2a2   : > { %v1076_v18 = vsub.f32 1.0, %v1075_v33 }
 0x2a3   : > { %v1037_v17 = vunpack.c.l.b16 %v1005_v13  ;;  %v1889_v13 = vor.u32 %v2024_v10, %v1886_v12 }
 0x2a4   : > { %v1077_v21 = vmul.f32 %v2199_v32, %v1076_v18  ;;  %v1860_v18 = vld [vmem:[#allocation11] sm:$0xf] }
 0x2a5   : > { %v1038_v22 = vpack.c.b16 %v1037_v17, %v1036_v14  ;;  %1293 = vmatpush.bf16.msrb.mxu1 %v1889_v13  ;;  %v1876_v14 = vld [vmem:[#allocation11 + $0x20] sm:$0xf]  ;;  %v2023_v17 = vld [vmem:[#allocation11 + $0x24] sm:$0xf0] }
 0x2a7   : > { %1857 = vmatmul.msk.bf16.vlgmr.msrb.gmra.mxu3 %vm957_vm0, %v1038_v22  ;;  %v2022_v22 = vld [vmem:[#allocation11 + $0x24] sm:$0xf] }
 0x31a   : > { %v1029_v23 = vpop.f32.mrf.mxu3 }
 0x31b   : > { %v1062_v24 = vadd.f32 %v1029_v23, %v2770_v15  ;;  %v1078_v15 = vadd.f32 %v2199_v32, %v1077_v21  ;;  %v1877_v23 = vor.u32 %v2023_v17, %v1876_v14  ;;  %v2019_v21 = vld [vmem:[#allocation11 + $0x4] sm:$0xf0]  ;;  %v2038_v14 = vld [vmem:[#allocation13 + $0x20] sm:$0xff] }
 0x31c   : > { %v2046_v17 = vld [vmem:[#allocation13 + $0x60] sm:$0xff]  ;;  %1454 = vmatpush.bf16.msrb.mxu2 %v2038_v14 }
 0x31d   : > { %1066 = vadd.xlane.f32.xlu2 %v1062_v24  ;;  %v2815_v34 = vsel %vm1079_vm1, %v2199_v32, %v1078_v15  ;;  %1275 = vmatpush.bf16.msrb.mxu0 %v1877_v23  ;;  %v2018_v15 = vld [vmem:[#allocation11 + $0x4] sm:$0xf] }
 0x31e   : > { %2055 = vmatpush.bf16.msra.mxu3 %v2046_v17 }
 0x322   : > { %v1031_v25 = vpop.f32.mrf.mxu3 }
 0x323   : > { %v1063_v26 = vadd.f32 %v1031_v25, %v2773_v16 }
 0x325   : > { %1068 = vadd.xlane.f32.xlu0 %v1063_v26 }
 0x32a   : > { %v1057_v27 = vpop.f32.mrf.mxu3 }
 0x32b   : > { %v1064_v28 = vadd.f32 %v1057_v27, %v2782_v19  ;;  %v2021_v27 = vld [vmem:[#allocation11 + $0x14] sm:$0xf0] }
 0x32d   : > { %1070 = vadd.xlane.f32.xlu1 %v1064_v28 }
 0x332   : > { %v1059_v29 = vpop.f32.mrf.mxu3 }
 0x333   : > { %v1065_v30 = vadd.f32 %v1059_v29, %v2785_v20 }
 0x335   : > { %1072 = vadd.xlane.f32.xlu2 %v1065_v30 }
 0x390   : > { %v1067_v16 = vpop.xlane.xlu2 %1066 }
 0x391   : > { %v1081_v35 = vmul.f32 %v2815_v34, %v1067_v16  ;;  %v1861_v16 = vor.u32 %v2019_v21, %v1860_v18 }
 0x393   : > { %v2818_v36 = vsub.f32 %v1062_v24, %v1081_v35  ;;  %v1878_v24 = vld [vmem:[#allocation11 + $0x28] sm:$0xf0] }
 0x394   : > { %v1881_v25 = vor.u32 %v2022_v22, %v1878_v24  ;;  %v1862_v35 = vld [vmem:[#allocation11 + $0x8] sm:$0xf0] }
 0x395   : > { %v1089_v19 = vmul.f32 %v2818_v36, %v2818_v36 }
 0x396   : > { %1294 = vmatpush.bf16.msrb.mxu1 %v1881_v25 }
 0x397   : > { %1093 = vadd.xlane.f32.xlu0 %v1089_v19 }
 0x398   : > { %v1069_v20 = vpop.xlane.xlu0 %1068 }
 0x399   : > { %v1082_v37 = vmul.f32 %v2815_v34, %v1069_v20  ;;  %v1865_v20 = vor.u32 %v2018_v15, %v1862_v35 }
 0x39b   : > { %v2823_v38 = vsub.f32 %v1063_v26, %v1082_v37  ;;  %v1868_v26 = vld [vmem:[#allocation11 + $0x10] sm:$0xf] }
 0x39c   : > { %v1869_v29 = vor.u32 %v2021_v27, %v1868_v26 }
 0x39d   : > { %v1090_v39 = vmul.f32 %v2823_v38, %v2823_v38 }
 0x39e   : > { %1276 = vmatpush.bf16.msrb.mxu0 %v1869_v29 }
 0x39f   : > { %1095 = vadd.xlane.f32.xlu1 %v1090_v39 }
 0x3a0   : > { %v1071_v40 = vpop.xlane.xlu1 %1070 }
 0x3a1   : > { %v1083_v41 = vmul.f32 %v2815_v34, %v1071_v40 }
 0x3a2   : > { %1277 = vmatpush.bf16.msrb.mxu0 %v1861_v16 }
 0x3a3   : > { %v2828_v42 = vsub.f32 %v1064_v28, %v1083_v41  ;;  %v2020_v28 = vld [vmem:[#allocation11 + $0x14] sm:$0xf] }
 0x3a5   : > { %v1091_v43 = vmul.f32 %v2828_v42, %v2828_v42 }
 0x3a6   : > { %1470 = vmatpush.bf16.msra.mxu0 %v2049_v56 }
 0x3a7   : > { %1097 = vadd.xlane.f32.xlu2 %v1091_v43 }
 0x3a8   : > { %v1073_v44 = vpop.xlane.xlu2 %1072 }
 0x3a9   : > { %v1084_v45 = vmul.f32 %v2815_v34, %v1073_v44 }
 0x3aa   : > { %1471 = vmatpush.bf16.msra.mxu0 %v2048_v62 }
 0x3ab   : > { %v2833_v46 = vsub.f32 %v1065_v30, %v1084_v45  ;;  %v1870_v30 = vld [vmem:[#allocation11 + $0x18] sm:$0xf0] }
 0x3ac   : > { %v1873_v31 = vor.u32 %v2020_v28, %v1870_v30 }
 0x3ad   : > { %v1092_v47 = vmul.f32 %v2833_v46, %v2833_v46 }
 0x3ae   : > { %1295 = vmatpush.bf16.msrb.mxu1 %v1873_v31  ;;  %1472 = vmatpush.bf16.msra.mxu0 %v2047_v7 }
 0x3af   : > { %1099 = vadd.xlane.f32.xlu0 %v1092_v47 }
 0x3b2   : > { %1296 = vmatpush.bf16.msrb.mxu1 %v1865_v20  ;;  %1473 = vmatpush.bf16.msra.mxu0 %v2046_v17 }
 0x40a   : > { %v1094_v32 = vpop.xlane.xlu0 %1093 }
 0x40b   : > { %v1101_v33 = vmul.f32 %v1094_v32, %v2815_v34 }
 0x40d   : > { %v1105_v19 = vadd.f32 1e-05, %v1101_v33 }
 0x40f   : > { %2200 = vrsqrt.f32 %v1105_v19  ;;  %vm1115_vm3 = vweird.f32 %v1105_v19 }
 0x412   : > { %v1096_v37 = vpop.xlane.xlu1 %1095 }
 0x413   : > { %v1102_v39 = vmul.f32 %v1096_v37, %v2815_v34  ;;  %v2037_v37 = vld [vmem:[#allocation13 + $0x18] sm:$0xff] }
 0x414   : > { %1455 = vmatpush.bf16.msrb.mxu2 %v2037_v37 }
 0x415   : > { %v2201_v40 = vpop.eup %2200  ;;  %v1106_v41 = vadd.f32 1e-05, %v1102_v39  ;;  %v2045_v39 = vld [vmem:[#allocation13 + $0x58] sm:$0xff] }
 0x416   : > { %v1110_v43 = vmul.f32 %v2201_v40, %v1105_v19  ;;  %vm1116_vm2 = vweird.f32 %v2201_v40  ;;  %1474 = vmatpush.bf16.msra.mxu0 %v2045_v39  ;;  %2056 = vmatpush.bf16.msra.mxu3 %v2045_v39 }
 0x417   : > { %2202 = vrsqrt.f32 %v1106_v41  ;;  %vm1117_vm4 = vmor %vm1115_vm3, %vm1116_vm2  ;;  %vm1125_vm6 = vweird.f32 %v1106_v41 }
 0x418   : > { %v1111_v44 = vmul.f32 %v2201_v40, %v1110_v43  ;;  %v2034_v43 = vld [vmem:[#allocation13] sm:$0xff] }
 0x41a   : > { %v1112_v45 = vmul.f32 0.5, %v1111_v44  ;;  %v1098_v47 = vpop.xlane.xlu2 %1097  ;;  %v2042_v44 = vld [vmem:[#allocation13 + $0x40] sm:$0xff] }
 0x41b   : > { %v1103_v48 = vmul.f32 %v1098_v47, %v2815_v34 }
 0x41c   : > { %v1113_v49 = vsub.f32 1.5, %v1112_v45  ;;  %v627_v45 = vld [vmem:[%s2949_s10] sm:$0x3] }
 0x41d   : > { %v2203_v50 = vpop.eup %2202  ;;  %v1107_v51 = vadd.f32 1e-05, %v1103_v48 }
 0x41e   : > { %v1114_v52 = vmul.f32 %v2201_v40, %v1113_v49  ;;  %v1120_v53 = vmul.f32 %v2203_v50, %v1106_v41  ;;  %vm1126_vm5 = vweird.f32 %v2203_v50  ;;  %v2043_v41 = vld [vmem:[#allocation13 + $0x48] sm:$0xff]  ;;  %v1186_v49 = vperm.slane %v627_v45, 0 }
 0x41f   : > { %2204 = vrsqrt.f32 %v1107_v51  ;;  %vm1127_vm7 = vmor %vm1125_vm6, %vm1126_vm5  ;;  %vm1135_vm9 = vweird.f32 %v1107_v51 }
 0x420   : > { %v1121_v54 = vmul.f32 %v2203_v50, %v1120_v53  ;;  %v1118_v57 = vsel %vm1117_vm4, %v2201_v40, %v1114_v52  ;;  %v2044_v40 = vld [vmem:[#allocation13 + $0x50] sm:$0xff] }
 0x421   : > { %v1149_v1 = vmul.f32 %v1118_v57, %v2818_v36  ;;  %1475 = vmatpush.bf16.msra.mxu0 %v2044_v40  ;;  %2057 = vmatpush.bf16.msra.mxu3 %v2044_v40 }
 0x422   : > { %v1122_v58 = vmul.f32 0.5, %v1121_v54  ;;  %v1100_v59 = vpop.xlane.xlu0 %1099 }
 0x423   : > { %v1104_v60 = vmul.f32 %v1100_v59, %v2815_v34  ;;  %v1156_v36 = vmul.f32 %v2177_v3, %v1149_v1 }
 0x424   : > { %v1123_v63 = vsub.f32 1.5, %v1122_v58 }
 0x425   : > { %v2205_v0 = vpop.eup %2204  ;;  %v1108_v2 = vadd.f32 1e-05, %v1104_v60  ;;  %v2849_v24 = vadd.f32 %v2178_v11, %v1156_v36  ;;  %1476 = vmatpush.bf16.msra.mxu0 %v2043_v41  ;;  %2058 = vmatpush.bf16.msra.mxu3 %v2043_v41 }
 0x426   : > { %v1124_v4 = vmul.f32 %v2203_v50, %v1123_v63  ;;  %v1130_v5 = vmul.f32 %v2205_v0, %v1107_v51  ;;  %vm1136_vm8 = vweird.f32 %v2205_v0 }
 0x427   : > { %2206 = vrsqrt.f32 %v1108_v2  ;;  %vm1137_vm10 = vmor %vm1135_vm9, %vm1136_vm8  ;;  %vm1145_vm12 = vweird.f32 %v1108_v2 }
 0x428   : > { %v1128_v8 = vsel %vm1127_vm7, %v2203_v50, %v1124_v4  ;;  %v1131_v9 = vmul.f32 %v2205_v0, %v1130_v5  ;;  %v1187_v50 = vperm.slane %v627_v45, 1 }
 0x429   : > { %v1150_v10 = vmul.f32 %v1128_v8, %v2823_v38  ;;  %1477 = vmatpush.bf16.msra.mxu0 %v2042_v44  ;;  %2059 = vmatpush.bf16.msra.mxu3 %v2042_v44 }
 0x42a   : > { %v1132_v12 = vmul.f32 0.5, %v1131_v9 }
 0x42b   : > { %v1157_v13 = vmul.f32 %v2177_v3, %v1150_v10 }
 0x42c   : > { %v1133_v22 = vsub.f32 1.5, %v1132_v12  ;;  %v2179_v12 = vld [vmem:[%s2951_s12] ss:$0 sm:$0xff] }
 0x42d   : > { %v2207_v23 = vpop.eup %2206  ;;  %v2851_v25 = vadd.f32 %v2178_v11, %v1157_v13 }
 0x42e   : > { %v1134_v26 = vmul.f32 %v2205_v0, %v1133_v22  ;;  %v1140_v38 = vmul.f32 %v2207_v23, %v1108_v2  ;;  %vm1146_vm11 = vweird.f32 %v2207_v23 }
 0x42f   : > { %v1167_v27 = vpack.c.bf16 %v2851_v25, %v2849_v24  ;;  %vm1147_vm13 = vmor %vm1145_vm12, %vm1146_vm11 }
 0x430   : > { %v1141_v28 = vmul.f32 %v2207_v23, %v1140_v38  ;;  %v1138_v30 = vsel %vm1137_vm10, %v2205_v0, %v1134_v26 }
 0x431   : > { %1278 = vmatmul.bf16.vlgmr.msrb.gmra.mxu0 %v1167_v27  ;;  %1297 = vmatmul.bf16.vlgmr.msrb.gmra.mxu1 %v1167_v27  ;;  %v1151_v32 = vmul.f32 %v1138_v30, %v2828_v42  ;;  %v2036_v42 = vld [vmem:[#allocation13 + $0x10] sm:$0xff] }
 0x432   : > { %v1142_v29 = vmul.f32 0.5, %v1141_v28  ;;  %1456 = vmatpush.bf16.msrb.mxu2 %v2036_v42 }
 0x433   : > { %v1158_v15 = vmul.f32 %v2177_v3, %v1151_v32 }
 0x434   : > { %v1143_v31 = vsub.f32 1.5, %v1142_v29 }
 0x435   : > { %v2857_v35 = vadd.f32 %v2178_v11, %v1158_v15 }
 0x436   : > { %v1144_v33 = vmul.f32 %v2207_v23, %v1143_v31 }
 0x438   : > { %v1148_v18 = vsel %vm1147_vm13, %v2207_v23, %v1144_v33 }
 0x439   : > { %v1152_v21 = vmul.f32 %v1148_v18, %v2833_v46  ;;  %v2035_v46 = vld [vmem:[#allocation13 + $0x8] sm:$0xff] }
 0x43a   : > { %1457 = vmatpush.bf16.msrb.mxu2 %v2035_v46 }
 0x43b   : > { %v1159_v16 = vmul.f32 %v2177_v3, %v1152_v21 }
 0x43d   : > { %v2859_v19 = vadd.f32 %v2178_v11, %v1159_v16 }
 0x43e   : > { %1458 = vmatpush.bf16.msrb.mxu2 %v2034_v43 }
 0x43f   : > { %v1168_v20 = vpack.c.bf16 %v2859_v19, %v2857_v35 }
 0x441   : > { %1283 = vmatmul.bf16.gmra.mxu0 %v1168_v20  ;;  %1302 = vmatmul.bf16.gmra.mxu1 %v1168_v20 }
 0x4ae   : > { %v1279_v47 = vpop.f32.mrf.mxu0  ;;  %v1298_v48 = vpop.f32.mrf.mxu1 }
 0x4af   : > { %v1280_v51 = vadd.f32 %v1279_v47, %v1186_v49  ;;  %v1299_v52 = vadd.f32 %v1298_v48, %v1187_v50 }
 0x4b1   : > { %v1308_v57 = vmax.f32 %v1280_v51, 0.0  ;;  %v1309_v58 = vmax.f32 %v1299_v52, 0.0 }
 0x4b6   : > { %v1281_v53 = vpop.f32.mrf.mxu0  ;;  %v1300_v54 = vpop.f32.mrf.mxu1 }
 0x4b7   : > { %v1282_v55 = vadd.f32 %v1281_v53, %v1186_v49  ;;  %v1301_v56 = vadd.f32 %v1300_v54, %v1187_v50 }
 0x4b9   : > { %v1310_v59 = vmax.f32 %v1282_v55, 0.0  ;;  %v1311_v60 = vmax.f32 %v1301_v56, 0.0 }
 0x4bb   : > { %v1316_v61 = vpack.c.bf16 %v1310_v59, %v1308_v57  ;;  %v1317_v62 = vpack.c.bf16 %v1311_v60, %v1309_v58 }
 0x4bd   : > { %1459 = vmatmul.bf16.vlgmr.msrb.gmra.mxu2 %v1316_v61  ;;  %1478 = vmatmul.bf16.vlgmr.msra.gmra.mxu0 %v1317_v62 }
 0x4be   : > { %v1284_v63 = vpop.f32.mrf.mxu0  ;;  %v1303_v0 = vpop.f32.mrf.mxu1 }
 0x4bf   : > { %v1285_v1 = vadd.f32 %v1284_v63, %v1186_v49  ;;  %v1304_v2 = vadd.f32 %v1303_v0, %v1187_v50 }
 0x4c1   : > { %v1312_v7 = vmax.f32 %v1285_v1, 0.0  ;;  %v1313_v8 = vmax.f32 %v1304_v2, 0.0 }
 0x4c6   : > { %v1286_v3 = vpop.f32.mrf.mxu0  ;;  %v1305_v4 = vpop.f32.mrf.mxu1 }
 0x4c7   : > { %v1287_v5 = vadd.f32 %v1286_v3, %v1186_v49  ;;  %v1306_v6 = vadd.f32 %v1305_v4, %v1187_v50  ;;  %v2180_v4 = vld [vmem:[%s2983_s3] ss:$0 sm:$0xff] }
 0x4c9   : > { %v1314_v9 = vmax.f32 %v1287_v5, 0.0  ;;  %v1315_v10 = vmax.f32 %v1306_v6, 0.0 }
 0x4cb   : > { %v1319_v36 = vpack.c.bf16 %v1315_v10, %v1313_v8  ;;  %v1318_v11 = vpack.c.bf16 %v1314_v9, %v1312_v7  ;;  %v2181_v7 = vld [vmem:[%s2984_s26] ss:$0 sm:$0xff] }
 0x4cd   : > { %1464 = vmatmul.bf16.gmra.mxu2 %v1318_v11  ;;  %1483 = vmatmul.bf16.vlgmr.msra.gmra.mxu3 %v1319_v36 }
 0x53a   : > { %v1479_v13 = vpop.f32.mrf.mxu0 }
 0x540   : > { %v1460_v14 = vpop.f32.mrf.mxu2 }
 0x541   : > { %v1461_v17 = vadd.f32 %v2179_v12, %v1460_v14 }
 0x542   : > { %v1481_v27 = vpop.f32.mrf.mxu0 }
 0x543   : > { %v1480_v22 = vadd.f32 %v1479_v13, %v1461_v17 }
 0x545   : > { %v1489_v23 = vadd.f32 %v1480_v22, %v2849_v24 }
 0x547   : > { %1493 = vadd.xlane.f32.xlu1 %v1489_v23 }
 0x548   : > { %v1462_v26 = vpop.f32.mrf.mxu2 }
 0x549   : > { %v1463_v38 = vadd.f32 %v2179_v12, %v1462_v26 }
 0x54b   : > { %v1482_v28 = vadd.f32 %v1481_v27, %v1463_v38 }
 0x54d   : > { %v1490_v29 = vadd.f32 %v1482_v28, %v2851_v25 }
 0x54f   : > { %1495 = vadd.xlane.f32.xlu2 %v1490_v29 }
 0x550   : > { %v1465_v30 = vpop.f32.mrf.mxu2  ;;  %v1484_v31 = vpop.f32.mrf.mxu3 }
 0x551   : > { %v1466_v32 = vadd.f32 %v2179_v12, %v1465_v30 }
 0x553   : > { %v1485_v33 = vadd.f32 %v1484_v31, %v1466_v32 }
 0x555   : > { %v1491_v18 = vadd.f32 %v1485_v33, %v2857_v35 }
 0x557   : > { %1497 = vadd.xlane.f32.xlu0 %v1491_v18 }
 0x558   : > { %v1467_v21 = vpop.f32.mrf.mxu2  ;;  %v1486_v16 = vpop.f32.mrf.mxu3 }
 0x559   : > { %v1468_v15 = vadd.f32 %v2179_v12, %v1467_v21 }
 0x55b   : > { %v1487_v20 = vadd.f32 %v1486_v16, %v1468_v15 }
 0x55d   : > { %v1492_v24 = vadd.f32 %v1487_v20, %v2859_v19 }
 0x55f   : > { %1499 = vadd.xlane.f32.xlu1 %v1492_v24 }
 0x5ba   : > { %v1494_v37 = vpop.xlane.xlu1 %1493 }
 0x5bb   : > { %v1501_v39 = vmul.f32 %v1494_v37, %v2815_v34 }
 0x5bd   : > { %v1505_v42 = vsub.f32 %v1489_v23, %v1501_v39 }
 0x5bf   : > { %v1509_v25 = vmul.f32 %v1505_v42, %v1505_v42 }
 0x5c1   : > { %1513 = vadd.xlane.f32.xlu2 %v1509_v25 }
 0x5c2   : > { %v1496_v40 = vpop.xlane.xlu2 %1495 }
 0x5c3   : > { %v1502_v46 = vmul.f32 %v1496_v40, %v2815_v34 }
 0x5c5   : > { %v1506_v41 = vsub.f32 %v1490_v29, %v1502_v46 }
 0x5c7   : > { %v1510_v43 = vmul.f32 %v1506_v41, %v1506_v41 }
 0x5c9   : > { %1515 = vadd.xlane.f32.xlu0 %v1510_v43 }
 0x5ca   : > { %v1498_v35 = vpop.xlane.xlu0 %1497 }
 0x5cb   : > { %v1503_v44 = vmul.f32 %v1498_v35, %v2815_v34 }
 0x5cd   : > { %v2876_v45 = vsub.f32 %v1491_v18, %v1503_v44 }
 0x5cf   : > { %v1511_v19 = vmul.f32 %v2876_v45, %v2876_v45 }
 0x5d1   : > { %1517 = vadd.xlane.f32.xlu1 %v1511_v19 }
 0x5d2   : > { %v1500_v47 = vpop.xlane.xlu1 %1499 }
 0x5d3   : > { %v1504_v48 = vmul.f32 %v1500_v47, %v2815_v34 }
 0x5d5   : > { %v2881_v49 = vsub.f32 %v1492_v24, %v1504_v48 }
 0x5d7   : > { %v1512_v50 = vmul.f32 %v2881_v49, %v2881_v49 }
 0x5d9   : > { %1519 = vadd.xlane.f32.xlu2 %v1512_v50 }
 0x634   : > { %v1514_v51 = vpop.xlane.xlu2 %1513 }
 0x635   : > { %v1521_v52 = vmul.f32 %v1514_v51, %v2815_v34 }
 0x637   : > { %v1525_v53 = vadd.f32 1e-05, %v1521_v52 }
 0x639   : > { %2208 = vrsqrt.f32 %v1525_v53  ;;  %vm1535_vm15 = vweird.f32 %v1525_v53 }
 0x63c   : > { %v1516_v54 = vpop.xlane.xlu0 %1515 }
 0x63d   : > { %v1522_v55 = vmul.f32 %v1516_v54, %v2815_v34 }
 0x63f   : > { %v2209_v56 = vpop.eup %2208  ;;  %v1526_v57 = vadd.f32 1e-05, %v1522_v55 }
 0x640   : > { %v1530_v58 = vmul.f32 %v2209_v56, %v1525_v53  ;;  %vm1536_vm14 = vweird.f32 %v2209_v56 }
 0x641   : > { %2210 = vrsqrt.f32 %v1526_v57  ;;  %vm1537_vm0 = vmor %vm1535_vm15, %vm1536_vm14  ;;  %vm1545_vm2 = vweird.f32 %v1526_v57 }
 0x642   : > { %v1531_v59 = vmul.f32 %v2209_v56, %v1530_v58 }
 0x644   : > { %v1532_v60 = vmul.f32 0.5, %v1531_v59  ;;  %v1518_v61 = vpop.xlane.xlu1 %1517 }
 0x645   : > { %v1523_v62 = vmul.f32 %v1518_v61, %v2815_v34 }
 0x646   : > { %v1533_v63 = vsub.f32 1.5, %v1532_v60 }
 0x647   : > { %v2211_v0 = vpop.eup %2210  ;;  %v1527_v1 = vadd.f32 1e-05, %v1523_v62 }
 0x648   : > { %v1534_v2 = vmul.f32 %v2209_v56, %v1533_v63  ;;  %v1540_v3 = vmul.f32 %v2211_v0, %v1526_v57  ;;  %vm1546_vm1 = vweird.f32 %v2211_v0 }
 0x649   : > { %2212 = vrsqrt.f32 %v1527_v1  ;;  %vm1547_vm3 = vmor %vm1545_vm2, %vm1546_vm1  ;;  %vm1555_vm5 = vweird.f32 %v1527_v1 }
 0x64a   : > { %v1538_v5 = vsel %vm1537_vm0, %v2209_v56, %v1534_v2  ;;  %v1541_v6 = vmul.f32 %v2211_v0, %v1540_v3 }
 0x64b   : > { %v1569_v8 = vmul.f32 %v1538_v5, %v1505_v42 }
 0x64c   : > { %v1542_v9 = vmul.f32 0.5, %v1541_v6  ;;  %v1520_v10 = vpop.xlane.xlu2 %1519 }
 0x64d   : > { %v1576_v36 = vmul.f32 %v2180_v4, %v1569_v8  ;;  %v1524_v11 = vmul.f32 %v1520_v10, %v2815_v34 }
 0x64e   : > { %v1543_v12 = vsub.f32 1.5, %v1542_v9 }
 0x64f   : > { %v2213_v13 = vpop.eup %2212  ;;  %v1583_v14 = vadd.f32 %v2181_v7, %v1576_v36  ;;  %v1528_v17 = vadd.f32 1e-05, %v1524_v11 }
 0x650   : > { %v1544_v22 = vmul.f32 %v2211_v0, %v1543_v12  ;;  %v1550_v23 = vmul.f32 %v2213_v13, %v1527_v1  ;;  %vm1556_vm4 = vweird.f32 %v2213_v13 }
 0x651   : > { %1587 = vst [vmem:[%s2897_s13] sm:$0xff] %v1583_v14  ;;  %2214 = vrsqrt.f32 %v1528_v17  ;;  %vm1557_vm6 = vmor %vm1555_vm5, %vm1556_vm4  ;;  %vm1565_vm8 = vweird.f32 %v1528_v17 }
 0x652   : > { %v1548_v26 = vsel %vm1547_vm3, %v2211_v0, %v1544_v22  ;;  %v1551_v38 = vmul.f32 %v2213_v13, %v1550_v23 }
 0x653   : > { %v1570_v27 = vmul.f32 %v1548_v26, %v1506_v41 }
 0x654   : > { %v1552_v34 = vmul.f32 0.5, %v1551_v38 }
 0x655   : > { %v1577_v28 = vmul.f32 %v2180_v4, %v1570_v27 }
 0x656   : > { %v1553_v29 = vsub.f32 1.5, %v1552_v34 }
 0x657   : > { %v2215_v30 = vpop.eup %2214  ;;  %v1584_v31 = vadd.f32 %v2181_v7, %v1577_v28 }
 0x658   : > { %v1554_v32 = vmul.f32 %v2213_v13, %v1553_v29  ;;  %v1560_v33 = vmul.f32 %v2215_v30, %v1528_v17  ;;  %vm1566_vm7 = vweird.f32 %v2215_v30 }
 0x659   : > { %1588 = vst [vmem:[%s2897_s13 + $0x8] sm:$0xff] %v1584_v31  ;;  %vm1567_vm9 = vmor %vm1565_vm8, %vm1566_vm7 }
 0x65a   : > { %v1558_v18 = vsel %vm1557_vm6, %v2213_v13, %v1554_v32  ;;  %v1561_v21 = vmul.f32 %v2215_v30, %v1560_v33 }
 0x65b   : > { %v1571_v15 = vmul.f32 %v1558_v18, %v2876_v45 }
 0x65c   : > { %v1562_v16 = vmul.f32 0.5, %v1561_v21 }
 0x65d   : > { %v1578_v20 = vmul.f32 %v2180_v4, %v1571_v15 }
 0x65e   : > { %v1563_v24 = vsub.f32 1.5, %v1562_v16 }
 0x65f   : > { %v1585_v37 = vadd.f32 %v2181_v7, %v1578_v20 }
 0x660   : > { %v1564_v39 = vmul.f32 %v2215_v30, %v1563_v24 }
 0x661   : > { %1589 = vst [vmem:[%s2897_s13 + $0x10] sm:$0xff] %v1585_v37 }
 0x662   : > { %v1568_v42 = vsel %vm1567_vm9, %v2215_v30, %v1564_v39 }
 0x663   : > { %v1572_v25 = vmul.f32 %v1568_v42, %v2881_v49 }
 0x665   : > { %v1579_v40 = vmul.f32 %v2180_v4, %v1572_v25 }
 0x667   : > { %v1586_v46 = vadd.f32 %v2181_v7, %v1579_v40 }
 0x669   : > { %1590 = vst [vmem:[%s2897_s13 + $0x18] sm:$0xff] %v1586_v46 }
 0x66a   : > { %2453 = shalt.err (!%p2450_p9)
}
 0x66b   : > { %s2517_s30 = smov 128   ;;  %s2518_s13 = smov 8  }
 0x66c   : > { %2086 = dma.vmem_to_hbm [thread:$0]  (%p2711_p4), %s1606_s17, 512, %s1608_s14, %s1592_s25, %s2517_s30, %s2517_s30, %s2518_s13  }
 0x66d PF: > { %s1622_s11 = sand.u32 1, %s2492_s18   ;;  %p2986_p10 = scmp.ge.s32.totalorder %s2504_s21, 2 }
 0x66e   : > { %s1623_s28 = scalar_lea.sflag [#allocation4], %s1622_s11 }
 0x66f   : > { %p2112_p13 = pnand %p2986_p10, %p2715_p6 }
 0x671   : > { %p2113_p11 = pneg %p2112_p13 }
 0x673   : > { %2487 = dma.done.wait (%p2113_p11), %s1623_s28, 512  }
 0x674   : > { %2489 = vsyncadd (%p2113_p11), %s1623_s28, 4294966784  ;;  %s2987_s1 = sld [smem:[#allocation20_spill]]  ;;  %p31_p0 = scmp.ge.s32.totalorder %s2685_s16, 4  }
 0x675   : > { %s2988_s18 = smov %s2496_s19  ;;  %s2989_s19 = smov %s2500_s20 }
 0x676   : > { %s2991_s21 = smov %s2685_s16  ;;  %33 = sbr.rel (!%p31_p0) target bundleno = 18 (0x12), region = 149 }
 0x67a   : > { %s2990_s20 = smov %s2987_s1 }
 0x67b   :  { %1629 = vsyncpa [#allocation3], 1 }
 0x67c   :  { %1631 = vsyncpa [#allocation3 + $0x1], 1 }
 0x67d   :  { %1632 = vsyncpa [#allocation6], 1 }
 0x67e   :  { %1633 = vsyncpa [#allocation9], 1 }
 0x67f   :  { %1634 = vsyncpa [#allocation12], 1 }
 0x680   :  { %1635 = vsyncpa [#allocation4], 1 }
 0x681   :  { %1637 = vsyncpa [#allocation4 + $0x1], 1 }

</bundles_post_ra>
